<compile_context>
chip_gen: v7x
topology: tpu7x:2x2x1
jax: 0.10.0
libtpu: 0.0.40
codegen_flags: <defaults>
</compile_context>

<pallas_src>
import functools

import jax
import jax.numpy as jnp
from jax import lax
from jax.experimental import pallas as pl
from jax.experimental.pallas import tpu as pltpu


def _evolvenet_kernel(s_emb_ref,   # (Bt, H)     f32  ent_emb[s]
                      r_emb_ref,   # (Bt, H)     f32  rel_emb[r]
                      mean_ref,    # (T, Bt, H)  f32  pre-reduced neighbor means
                      lens_ref,    # (Bt, 1)     i32  history length per triple
                      w_i_ref,     # (3H, 3H)    bf16 input->gates, rows [s|mean|rel], cols [r|z|n]
                      w_h_ref,     # (H, 3H)     bf16 hidden->gates, cols [r|z|n]
                      b_i_ref,     # (1, 3H)     f32
                      b_h_ref,     # (1, 3H)     f32
                      out_ref):    # (Bt, H)     f32  final GRU hidden (original order)
    T, Bt, H = mean_ref.shape
    H3 = 3 * H

    lens = lens_ref[...]                                  # (Bt, 1) int32

    s_b = s_emb_ref[...].astype(jnp.bfloat16)
    r_b = r_emb_ref[...].astype(jnp.bfloat16)

    w_i_s = w_i_ref[0:H, :]          # multiplies ent_emb[s]
    w_i_m = w_i_ref[H:2 * H, :]      # multiplies mean_t   (only per-step input dot)
    w_i_r = w_i_ref[2 * H:3 * H, :]  # multiplies rel_emb[r]
    w_h = w_h_ref[...]

    # Time-invariant input-side contribution + input bias, hoisted out of the
    # recurrence (removes ~2/3 of the per-step input MXU FLOPs and the
    # per-step lane-axis concatenate).
    const = (jnp.dot(s_b, w_i_s, preferred_element_type=jnp.float32)
             + jnp.dot(r_b, w_i_r, preferred_element_type=jnp.float32)
             + b_i_ref[...])                              # (Bt, 3H)
    bh = jnp.broadcast_to(b_h_ref[...], (Bt, H3))         # hoisted broadcast

    def step(t, h):
        # Fused per-step gate pre-activations: 2 matmuls instead of 6.
        mean_t = mean_ref[t].astype(jnp.bfloat16)                       # (Bt, H)
        gi = jnp.dot(mean_t, w_i_m, preferred_element_type=jnp.float32) + const
        gh = jnp.dot(h.astype(jnp.bfloat16), w_h,
                     preferred_element_type=jnp.float32) + bh

        # PyTorch GRU gate order [r, z, n]:
        #   r = sigmoid(Wi_r x + bi_r + Wh_r h + bh_r)
        #   z = sigmoid(Wi_z x + bi_z + Wh_z h + bh_z)
        #   n = tanh(Wi_n x + bi_n + r * (Wh_n h + bh_n))
        r_g = jax.nn.sigmoid(gi[:, 0:H] + gh[:, 0:H])
        z_g = jax.nn.sigmoid(gi[:, H:2 * H] + gh[:, H:2 * H])
        n_g = jnp.tanh(gi[:, 2 * H:H3] + r_g * gh[:, 2 * H:H3])
        h_new = (1.0 - z_g) * n_g + z_g * h

        # Only advance rows whose history has >= t+1 steps; rows with empty
        # history keep h == 0 (matches the torch.zeros + inverse-permutation
        # logic in EvolveNet.forward).
        valid = t < lens                                  # (Bt, 1) bool
        return jnp.where(valid, h_new, h)

    h0 = jnp.zeros((Bt, H), dtype=jnp.float32)
    # T is small and static: fully unroll so adjacent steps' matmuls / EUP /
    # VPU work can co-issue.
    h_final = lax.fori_loop(0, T, step, h0, unroll=True)
    out_ref[...] = h_final


@functools.partial(jax.jit, static_argnames=("block_b",))
def evolvenet_forward(s_emb, r_emb, mean_tm, lens, w_i, w_h, b_i, b_h,
                      *, block_b=None):
    """s_emb/r_emb: (B, H) f32; mean_tm: (T, B, H) f32 pre-reduced means;
    lens: (B, 1) i32; w_i: (3H, 3H); w_h: (H, 3H); b_i/b_h: (1, 3H)."""
    B, H = s_emb.shape
    T = mean_tm.shape[0]
    H3 = 3 * H

    if block_b is None:
        block_b = B if B <= 128 else 128
    assert B % block_b == 0, "B must be a multiple of the B-tile"
    grid = (B // block_b,)

    # bf16 MXU operands (f32 accumulation stays inside the kernel).
    w_i_b = w_i.astype(jnp.bfloat16)
    w_h_b = w_h.astype(jnp.bfloat16)

    return pl.pallas_call(
        _evolvenet_kernel,
        out_shape=jax.ShapeDtypeStruct((B, H), jnp.float32),
        grid=grid,
        in_specs=[
            pl.BlockSpec((block_b, H), lambda i: (i, 0)),        # s_emb
            pl.BlockSpec((block_b, H), lambda i: (i, 0)),        # r_emb
            pl.BlockSpec((T, block_b, H), lambda i: (0, i, 0)),  # means (pipelined over B)
            pl.BlockSpec((block_b, 1), lambda i: (i, 0)),        # lens
            pl.BlockSpec((H3, H3), lambda i: (0, 0)),            # W_i (resident)
            pl.BlockSpec((H, H3), lambda i: (0, 0)),             # W_h (resident)
            pl.BlockSpec((1, H3), lambda i: (0, 0)),             # b_i
            pl.BlockSpec((1, H3), lambda i: (0, 0)),             # b_h
        ],
        out_specs=pl.BlockSpec((block_b, H), lambda i: (i, 0)),
        compiler_params=pltpu.CompilerParams(
            dimension_semantics=("parallel",),
            vmem_limit_bytes=32 * 1024 * 1024,
        ),
    )(s_emb, r_emb, mean_tm, lens, w_i_b, w_h_b, b_i, b_h)


def reference_forward(s_emb, r_emb, mean_tm, lens, w_ih, w_hh, b_ih, b_hh):
    """Pure-JAX reference using the original per-gate formulation (same bf16
    matmul-operand casts as the kernel, f32 accumulation)."""
    T, B, H = mean_tm.shape
    h = jnp.zeros((B, H), jnp.float32)
    for t in range(T):
        x = jnp.concatenate([s_emb, mean_tm[t], r_emb], axis=-1).astype(jnp.bfloat16)
        hb = h.astype(jnp.bfloat16)
        gi = [jnp.dot(x, w_ih[g].astype(jnp.bfloat16),
                      preferred_element_type=jnp.float32) + b_ih[g] for g in range(3)]
        gh = [jnp.dot(hb, w_hh[g].astype(jnp.bfloat16),
                      preferred_element_type=jnp.float32) + b_hh[g] for g in range(3)]
        r_g = jax.nn.sigmoid(gi[0] + gh[0])
        z_g = jax.nn.sigmoid(gi[1] + gh[1])
        n_g = jnp.tanh(gi[2] + r_g * gh[2])
        h_new = (1.0 - z_g) * n_g + z_g * h
        h = jnp.where(t < lens, h_new, h)
    return h


if __name__ == "__main__":
    # Small, deterministic problem consistent with EvolveNet.__init__.
    num_entities, num_relations = 64, 16
    H = 32          # hidden_dim
    T = 8           # seq_len
    B = 8           # batch of triples
    M = 4           # max neighbors per history step

    key = jax.random.PRNGKey(0)
    k = jax.random.split(key, 12)

    ent_emb = jax.random.normal(k[0], (num_entities, H), jnp.float32) * 0.1
    rel_emb = jax.random.normal(k[1], (num_relations, H), jnp.float32) * 0.1

    s_ids = jax.random.randint(k[2], (B,), 0, num_entities)
    r_ids = jax.random.randint(k[3], (B,), 0, num_relations)

    # Synthetic ragged history: per-triple length in [0, T], per-step neighbor
    # count in [1, M]; first triple forced to empty history.
    lens = jax.random.randint(k[4], (B,), 0, T + 1).at[0].set(0)
    nbr_ids = jax.random.randint(k[5], (B, T, M), 0, num_entities)
    nbr_counts = jax.random.randint(k[6], (B, T), 1, M + 1)
    step_valid = jnp.arange(T)[None, :] < lens[:, None]                      # (B, T)
    nbr_mask = (jnp.arange(M)[None, None, :] < nbr_counts[:, :, None]) \
               & step_valid[:, :, None]                                      # (B, T, M)
    nbr_mask_f = nbr_mask.astype(jnp.float32)

    # Glue (gather + masked-mean pre-reduction on the XLA side); the GRU
    # recurrence and all matmuls stay in-kernel.
    nbr_emb = ent_emb[nbr_ids] * nbr_mask_f[..., None]                       # (B, T, M, H)
    cnt = jnp.maximum(nbr_mask_f.sum(axis=2), 1.0)                           # (B, T)
    mean_bt = nbr_emb.sum(axis=2) / cnt[..., None]                           # (B, T, H)
    mean_tm = jnp.transpose(mean_bt, (1, 0, 2)).astype(jnp.float32)          # (T, B, H)

    s_emb = ent_emb[s_ids]                                                   # (B, H)
    r_emb = rel_emb[r_ids]                                                   # (B, H)
    lens_2d = lens[:, None].astype(jnp.int32)                                # (B, 1)

    # Deterministic GRU parameters (PyTorch-style U(-1/sqrt(H), 1/sqrt(H))),
    # stacked per gate [r, z, n], transposed for x @ W.
    scale = 1.0 / jnp.sqrt(jnp.float32(H))
    w_ih = jax.random.uniform(k[7], (3, 3 * H, H), jnp.float32, -scale, scale)
    w_hh = jax.random.uniform(k[8], (3, H, H), jnp.float32, -scale, scale)
    b_ih = jax.random.uniform(k[9], (3, 1, H), jnp.float32, -scale, scale)
    b_hh = jax.random.uniform(k[10], (3, 1, H), jnp.float32, -scale, scale)

    # Fused layouts for the kernel: cols [r | z | n].
    w_i_fused = jnp.concatenate([w_ih[0], w_ih[1], w_ih[2]], axis=1)         # (3H, 3H)
    w_h_fused = jnp.concatenate([w_hh[0], w_hh[1], w_hh[2]], axis=1)         # (H, 3H)
    b_i_fused = jnp.concatenate([b_ih[0], b_ih[1], b_ih[2]], axis=1)         # (1, 3H)
    b_h_fused = jnp.concatenate([b_hh[0], b_hh[1], b_hh[2]], axis=1)         # (1, 3H)

    out = evolvenet_forward(s_emb, r_emb, mean_tm, lens_2d,
                            w_i_fused, w_h_fused, b_i_fused, b_h_fused)
    out = jax.block_until_ready(out)

    ref = reference_forward(s_emb, r_emb, mean_tm, lens_2d,
                            w_ih, w_hh, b_ih, b_hh)

    assert out.shape == (B, H) and out.dtype == jnp.float32
    assert jnp.allclose(out, ref, atol=1e-2, rtol=1e-2), \
        f"max abs diff {jnp.max(jnp.abs(out - ref))}"
    # Empty-history row must be exactly zero (matches torch.zeros path).
    assert jnp.all(out[0] == 0.0)

    print("KERNEL_OK")
</pallas_src>

<mosaic_0001>
module attributes {stable_mosaic.version = 11 : i64} {
  func.func @_evolvenet_kernel(%arg0: i32, %arg1: memref<8x32xf32, #tpu.memory_space<vmem>>, %arg2: memref<8x32xf32, #tpu.memory_space<vmem>>, %arg3: memref<8x8x32xf32, #tpu.memory_space<vmem>>, %arg4: memref<8x1xi32, #tpu.memory_space<vmem>>, %arg5: memref<96x96xbf16, #tpu.memory_space<vmem>>, %arg6: memref<32x96xbf16, #tpu.memory_space<vmem>>, %arg7: memref<1x96xf32, #tpu.memory_space<vmem>>, %arg8: memref<1x96xf32, #tpu.memory_space<vmem>>, %arg9: memref<8x32xf32, #tpu.memory_space<vmem>>) attributes {dimension_semantics = [#tpu.dimension_semantics<parallel>], iteration_bounds = array<i64: 1>, scalar_prefetch = 0 : i64, scratch_operands = 0 : i64, tpu.core_type = #tpu.core_type<tc>, window_params = [{transform_indices = @transform_0, window_bounds = array<i64: 8, 32>}, {transform_indices = @transform_1, window_bounds = array<i64: 8, 32>}, {transform_indices = @transform_2, window_bounds = array<i64: 8, 8, 32>}, {transform_indices = @transform_3, window_bounds = array<i64: 8, 1>}, {pipeline_mode = #tpu.pipeline_mode<synchronous>, transform_indices = @transform_4, window_bounds = array<i64: 96, 96>}, {pipeline_mode = #tpu.pipeline_mode<synchronous>, transform_indices = @transform_5, window_bounds = array<i64: 32, 96>}, {pipeline_mode = #tpu.pipeline_mode<synchronous>, transform_indices = @transform_6, window_bounds = array<i64: 1, 96>}, {pipeline_mode = #tpu.pipeline_mode<synchronous>, transform_indices = @transform_7, window_bounds = array<i64: 1, 96>}, {transform_indices = @transform_8, window_bounds = array<i64: 8, 32>}]} {
    %c0 = arith.constant 0 : index
    %c0_0 = arith.constant 0 : index
    %0 = vector.load %arg4[%c0, %c0_0] : memref<8x1xi32, #tpu.memory_space<vmem>>, vector<8x1xi32>
    %c0_1 = arith.constant 0 : index
    %c0_2 = arith.constant 0 : index
    %1 = vector.load %arg1[%c0_1, %c0_2] : memref<8x32xf32, #tpu.memory_space<vmem>>, vector<8x32xf32>
    %2 = arith.truncf %1 : vector<8x32xf32> to vector<8x32xbf16>
    %c0_3 = arith.constant 0 : index
    %c0_4 = arith.constant 0 : index
    %3 = vector.load %arg2[%c0_3, %c0_4] : memref<8x32xf32, #tpu.memory_space<vmem>>, vector<8x32xf32>
    %4 = arith.truncf %3 : vector<8x32xf32> to vector<8x32xbf16>
    %c0_5 = arith.constant 0 : index
    %c0_6 = arith.constant 0 : index
    %5 = vector.load %arg5[%c0_5, %c0_6] : memref<96x96xbf16, #tpu.memory_space<vmem>>, vector<32x96xbf16>
    %c32 = arith.constant 32 : index
    %c0_7 = arith.constant 0 : index
    %6 = vector.load %arg5[%c32, %c0_7] : memref<96x96xbf16, #tpu.memory_space<vmem>>, vector<32x96xbf16>
    %c64 = arith.constant 64 : index
    %c0_8 = arith.constant 0 : index
    %7 = vector.load %arg5[%c64, %c0_8] : memref<96x96xbf16, #tpu.memory_space<vmem>>, vector<32x96xbf16>
    %c0_9 = arith.constant 0 : index
    %c0_10 = arith.constant 0 : index
    %8 = vector.load %arg6[%c0_9, %c0_10] : memref<32x96xbf16, #tpu.memory_space<vmem>>, vector<32x96xbf16>
    %cst = arith.constant dense<0.000000e+00> : vector<8x96xf32>
    %9 = tpu.matmul %2, %5, %cst {dimension_numbers = #tpu.dot_dimension_numbers<[1], [0], [0], [1], [0, 0, 1, 1], [], []>} : vector<8x32xbf16>, vector<32x96xbf16>, vector<8x96xf32> -> vector<8x96xf32>
    %cst_11 = arith.constant dense<0.000000e+00> : vector<8x96xf32>
    %10 = tpu.matmul %4, %7, %cst_11 {dimension_numbers = #tpu.dot_dimension_numbers<[1], [0], [0], [1], [0, 0, 1, 1], [], []>} : vector<8x32xbf16>, vector<32x96xbf16>, vector<8x96xf32> -> vector<8x96xf32>
    %11 = arith.addf %9, %10 : vector<8x96xf32>
    %c0_12 = arith.constant 0 : index
    %c0_13 = arith.constant 0 : index
    %12 = vector.load %arg7[%c0_12, %c0_13] : memref<1x96xf32, #tpu.memory_space<vmem>>, vector<1x96xf32>
    %13 = vector.broadcast %12 : vector<1x96xf32> to vector<8x96xf32>
    %14 = arith.addf %11, %13 : vector<8x96xf32>
    %c0_14 = arith.constant 0 : index
    %c0_15 = arith.constant 0 : index
    %15 = vector.load %arg8[%c0_14, %c0_15] : memref<1x96xf32, #tpu.memory_space<vmem>>, vector<1x96xf32>
    %16 = vector.shape_cast %15 : vector<1x96xf32> to vector<1x96xf32>
    %17 = vector.broadcast %16 : vector<1x96xf32> to vector<8x96xf32>
    %cst_16 = arith.constant 0.000000e+00 : f32
    %18 = vector.broadcast %cst_16 : f32 to vector<8x32xf32>
    %c0_i32 = arith.constant 0 : i32
    %19 = arith.index_cast %c0_i32 : i32 to index
    %c0_17 = arith.constant 0 : index
    %c0_18 = arith.constant 0 : index
    %20 = vector.load %arg3[%19, %c0_17, %c0_18] : memref<8x8x32xf32, #tpu.memory_space<vmem>>, vector<1x8x32xf32>
    %21 = vector.shape_cast %20 : vector<1x8x32xf32> to vector<8x32xf32>
    %22 = arith.truncf %21 : vector<8x32xf32> to vector<8x32xbf16>
    %cst_19 = arith.constant dense<0.000000e+00> : vector<8x96xf32>
    %23 = tpu.matmul %22, %6, %cst_19 {dimension_numbers = #tpu.dot_dimension_numbers<[1], [0], [0], [1], [0, 0, 1, 1], [], []>} : vector<8x32xbf16>, vector<32x96xbf16>, vector<8x96xf32> -> vector<8x96xf32>
    %24 = arith.addf %23, %14 : vector<8x96xf32>
    %25 = arith.truncf %18 : vector<8x32xf32> to vector<8x32xbf16>
    %cst_20 = arith.constant dense<0.000000e+00> : vector<8x96xf32>
    %26 = tpu.matmul %25, %8, %cst_20 {dimension_numbers = #tpu.dot_dimension_numbers<[1], [0], [0], [1], [0, 0, 1, 1], [], []>} : vector<8x32xbf16>, vector<32x96xbf16>, vector<8x96xf32> -> vector<8x96xf32>
    %27 = arith.addf %26, %17 : vector<8x96xf32>
    %28 = vector.extract_strided_slice %24 {offsets = [0, 0], sizes = [8, 32], strides = [1, 1]} : vector<8x96xf32> to vector<8x32xf32>
    %29 = vector.extract_strided_slice %27 {offsets = [0, 0], sizes = [8, 32], strides = [1, 1]} : vector<8x96xf32> to vector<8x32xf32>
    %30 = arith.addf %28, %29 : vector<8x32xf32>
    %31 = arith.negf %30 : vector<8x32xf32>
    %32 = math.exp %31 : vector<8x32xf32>
    %cst_21 = arith.constant 1.000000e+00 : f32
    %33 = vector.broadcast %cst_21 : f32 to vector<8x32xf32>
    %34 = arith.addf %33, %32 : vector<8x32xf32>
    %35 = arith.divf %33, %34 : vector<8x32xf32>
    %36 = vector.extract_strided_slice %24 {offsets = [0, 32], sizes = [8, 32], strides = [1, 1]} : vector<8x96xf32> to vector<8x32xf32>
    %37 = vector.extract_strided_slice %27 {offsets = [0, 32], sizes = [8, 32], strides = [1, 1]} : vector<8x96xf32> to vector<8x32xf32>
    %38 = arith.addf %36, %37 : vector<8x32xf32>
    %39 = arith.negf %38 : vector<8x32xf32>
    %40 = math.exp %39 : vector<8x32xf32>
    %cst_22 = arith.constant 1.000000e+00 : f32
    %41 = vector.broadcast %cst_22 : f32 to vector<8x32xf32>
    %42 = arith.addf %41, %40 : vector<8x32xf32>
    %43 = arith.divf %41, %42 : vector<8x32xf32>
    %44 = vector.extract_strided_slice %24 {offsets = [0, 64], sizes = [8, 32], strides = [1, 1]} : vector<8x96xf32> to vector<8x32xf32>
    %45 = vector.extract_strided_slice %27 {offsets = [0, 64], sizes = [8, 32], strides = [1, 1]} : vector<8x96xf32> to vector<8x32xf32>
    %46 = arith.mulf %35, %45 : vector<8x32xf32>
    %47 = arith.addf %44, %46 : vector<8x32xf32>
    %48 = math.tanh %47 : vector<8x32xf32>
    %cst_23 = arith.constant 1.000000e+00 : f32
    %49 = vector.broadcast %cst_23 : f32 to vector<8x32xf32>
    %50 = arith.subf %49, %43 : vector<8x32xf32>
    %51 = arith.mulf %50, %48 : vector<8x32xf32>
    %52 = arith.mulf %43, %18 : vector<8x32xf32>
    %53 = arith.addf %51, %52 : vector<8x32xf32>
    %54 = vector.broadcast %c0_i32 : i32 to vector<8x1xi32>
    %55 = arith.cmpi slt, %54, %0 : vector<8x1xi32>
    %56 = vector.shape_cast %55 : vector<8x1xi1> to vector<8x1xi1>
    %57 = vector.broadcast %56 : vector<8x1xi1> to vector<8x32xi1>
    %58 = arith.select %57, %53, %18 : vector<8x32xi1>, vector<8x32xf32>
    %c1_i32 = arith.constant 1 : i32
    %59 = arith.index_cast %c1_i32 : i32 to index
    %c0_24 = arith.constant 0 : index
    %c0_25 = arith.constant 0 : index
    %60 = vector.load %arg3[%59, %c0_24, %c0_25] : memref<8x8x32xf32, #tpu.memory_space<vmem>>, vector<1x8x32xf32>
    %61 = vector.shape_cast %60 : vector<1x8x32xf32> to vector<8x32xf32>
    %62 = arith.truncf %61 : vector<8x32xf32> to vector<8x32xbf16>
    %cst_26 = arith.constant dense<0.000000e+00> : vector<8x96xf32>
    %63 = tpu.matmul %62, %6, %cst_26 {dimension_numbers = #tpu.dot_dimension_numbers<[1], [0], [0], [1], [0, 0, 1, 1], [], []>} : vector<8x32xbf16>, vector<32x96xbf16>, vector<8x96xf32> -> vector<8x96xf32>
    %64 = arith.addf %63, %14 : vector<8x96xf32>
    %65 = arith.truncf %58 : vector<8x32xf32> to vector<8x32xbf16>
    %cst_27 = arith.constant dense<0.000000e+00> : vector<8x96xf32>
    %66 = tpu.matmul %65, %8, %cst_27 {dimension_numbers = #tpu.dot_dimension_numbers<[1], [0], [0], [1], [0, 0, 1, 1], [], []>} : vector<8x32xbf16>, vector<32x96xbf16>, vector<8x96xf32> -> vector<8x96xf32>
    %67 = arith.addf %66, %17 : vector<8x96xf32>
    %68 = vector.extract_strided_slice %64 {offsets = [0, 0], sizes = [8, 32], strides = [1, 1]} : vector<8x96xf32> to vector<8x32xf32>
    %69 = vector.extract_strided_slice %67 {offsets = [0, 0], sizes = [8, 32], strides = [1, 1]} : vector<8x96xf32> to vector<8x32xf32>
    %70 = arith.addf %68, %69 : vector<8x32xf32>
    %71 = arith.negf %70 : vector<8x32xf32>
    %72 = math.exp %71 : vector<8x32xf32>
    %cst_28 = arith.constant 1.000000e+00 : f32
    %73 = vector.broadcast %cst_28 : f32 to vector<8x32xf32>
    %74 = arith.addf %73, %72 : vector<8x32xf32>
    %75 = arith.divf %73, %74 : vector<8x32xf32>
    %76 = vector.extract_strided_slice %64 {offsets = [0, 32], sizes = [8, 32], strides = [1, 1]} : vector<8x96xf32> to vector<8x32xf32>
    %77 = vector.extract_strided_slice %67 {offsets = [0, 32], sizes = [8, 32], strides = [1, 1]} : vector<8x96xf32> to vector<8x32xf32>
    %78 = arith.addf %76, %77 : vector<8x32xf32>
    %79 = arith.negf %78 : vector<8x32xf32>
    %80 = math.exp %79 : vector<8x32xf32>
    %cst_29 = arith.constant 1.000000e+00 : f32
    %81 = vector.broadcast %cst_29 : f32 to vector<8x32xf32>
    %82 = arith.addf %81, %80 : vector<8x32xf32>
    %83 = arith.divf %81, %82 : vector<8x32xf32>
    %84 = vector.extract_strided_slice %64 {offsets = [0, 64], sizes = [8, 32], strides = [1, 1]} : vector<8x96xf32> to vector<8x32xf32>
    %85 = vector.extract_strided_slice %67 {offsets = [0, 64], sizes = [8, 32], strides = [1, 1]} : vector<8x96xf32> to vector<8x32xf32>
    %86 = arith.mulf %75, %85 : vector<8x32xf32>
    %87 = arith.addf %84, %86 : vector<8x32xf32>
    %88 = math.tanh %87 : vector<8x32xf32>
    %cst_30 = arith.constant 1.000000e+00 : f32
    %89 = vector.broadcast %cst_30 : f32 to vector<8x32xf32>
    %90 = arith.subf %89, %83 : vector<8x32xf32>
    %91 = arith.mulf %90, %88 : vector<8x32xf32>
    %92 = arith.mulf %83, %58 : vector<8x32xf32>
    %93 = arith.addf %91, %92 : vector<8x32xf32>
    %94 = vector.broadcast %c1_i32 : i32 to vector<8x1xi32>
    %95 = arith.cmpi slt, %94, %0 : vector<8x1xi32>
    %96 = vector.shape_cast %95 : vector<8x1xi1> to vector<8x1xi1>
    %97 = vector.broadcast %96 : vector<8x1xi1> to vector<8x32xi1>
    %98 = arith.select %97, %93, %58 : vector<8x32xi1>, vector<8x32xf32>
    %c2_i32 = arith.constant 2 : i32
    %99 = arith.index_cast %c2_i32 : i32 to index
    %c0_31 = arith.constant 0 : index
    %c0_32 = arith.constant 0 : index
    %100 = vector.load %arg3[%99, %c0_31, %c0_32] : memref<8x8x32xf32, #tpu.memory_space<vmem>>, vector<1x8x32xf32>
    %101 = vector.shape_cast %100 : vector<1x8x32xf32> to vector<8x32xf32>
    %102 = arith.truncf %101 : vector<8x32xf32> to vector<8x32xbf16>
    %cst_33 = arith.constant dense<0.000000e+00> : vector<8x96xf32>
    %103 = tpu.matmul %102, %6, %cst_33 {dimension_numbers = #tpu.dot_dimension_numbers<[1], [0], [0], [1], [0, 0, 1, 1], [], []>} : vector<8x32xbf16>, vector<32x96xbf16>, vector<8x96xf32> -> vector<8x96xf32>
    %104 = arith.addf %103, %14 : vector<8x96xf32>
    %105 = arith.truncf %98 : vector<8x32xf32> to vector<8x32xbf16>
    %cst_34 = arith.constant dense<0.000000e+00> : vector<8x96xf32>
    %106 = tpu.matmul %105, %8, %cst_34 {dimension_numbers = #tpu.dot_dimension_numbers<[1], [0], [0], [1], [0, 0, 1, 1], [], []>} : vector<8x32xbf16>, vector<32x96xbf16>, vector<8x96xf32> -> vector<8x96xf32>
    %107 = arith.addf %106, %17 : vector<8x96xf32>
    %108 = vector.extract_strided_slice %104 {offsets = [0, 0], sizes = [8, 32], strides = [1, 1]} : vector<8x96xf32> to vector<8x32xf32>
    %109 = vector.extract_strided_slice %107 {offsets = [0, 0], sizes = [8, 32], strides = [1, 1]} : vector<8x96xf32> to vector<8x32xf32>
    %110 = arith.addf %108, %109 : vector<8x32xf32>
    %111 = arith.negf %110 : vector<8x32xf32>
    %112 = math.exp %111 : vector<8x32xf32>
    %cst_35 = arith.constant 1.000000e+00 : f32
    %113 = vector.broadcast %cst_35 : f32 to vector<8x32xf32>
    %114 = arith.addf %113, %112 : vector<8x32xf32>
    %115 = arith.divf %113, %114 : vector<8x32xf32>
    %116 = vector.extract_strided_slice %104 {offsets = [0, 32], sizes = [8, 32], strides = [1, 1]} : vector<8x96xf32> to vector<8x32xf32>
    %117 = vector.extract_strided_slice %107 {offsets = [0, 32], sizes = [8, 32], strides = [1, 1]} : vector<8x96xf32> to vector<8x32xf32>
    %118 = arith.addf %116, %117 : vector<8x32xf32>
    %119 = arith.negf %118 : vector<8x32xf32>
    %120 = math.exp %119 : vector<8x32xf32>
    %cst_36 = arith.constant 1.000000e+00 : f32
    %121 = vector.broadcast %cst_36 : f32 to vector<8x32xf32>
    %122 = arith.addf %121, %120 : vector<8x32xf32>
    %123 = arith.divf %121, %122 : vector<8x32xf32>
    %124 = vector.extract_strided_slice %104 {offsets = [0, 64], sizes = [8, 32], strides = [1, 1]} : vector<8x96xf32> to vector<8x32xf32>
    %125 = vector.extract_strided_slice %107 {offsets = [0, 64], sizes = [8, 32], strides = [1, 1]} : vector<8x96xf32> to vector<8x32xf32>
    %126 = arith.mulf %115, %125 : vector<8x32xf32>
    %127 = arith.addf %124, %126 : vector<8x32xf32>
    %128 = math.tanh %127 : vector<8x32xf32>
    %cst_37 = arith.constant 1.000000e+00 : f32
    %129 = vector.broadcast %cst_37 : f32 to vector<8x32xf32>
    %130 = arith.subf %129, %123 : vector<8x32xf32>
    %131 = arith.mulf %130, %128 : vector<8x32xf32>
    %132 = arith.mulf %123, %98 : vector<8x32xf32>
    %133 = arith.addf %131, %132 : vector<8x32xf32>
    %134 = vector.broadcast %c2_i32 : i32 to vector<8x1xi32>
    %135 = arith.cmpi slt, %134, %0 : vector<8x1xi32>
    %136 = vector.shape_cast %135 : vector<8x1xi1> to vector<8x1xi1>
    %137 = vector.broadcast %136 : vector<8x1xi1> to vector<8x32xi1>
    %138 = arith.select %137, %133, %98 : vector<8x32xi1>, vector<8x32xf32>
    %c3_i32 = arith.constant 3 : i32
    %139 = arith.index_cast %c3_i32 : i32 to index
    %c0_38 = arith.constant 0 : index
    %c0_39 = arith.constant 0 : index
    %140 = vector.load %arg3[%139, %c0_38, %c0_39] : memref<8x8x32xf32, #tpu.memory_space<vmem>>, vector<1x8x32xf32>
    %141 = vector.shape_cast %140 : vector<1x8x32xf32> to vector<8x32xf32>
    %142 = arith.truncf %141 : vector<8x32xf32> to vector<8x32xbf16>
    %cst_40 = arith.constant dense<0.000000e+00> : vector<8x96xf32>
    %143 = tpu.matmul %142, %6, %cst_40 {dimension_numbers = #tpu.dot_dimension_numbers<[1], [0], [0], [1], [0, 0, 1, 1], [], []>} : vector<8x32xbf16>, vector<32x96xbf16>, vector<8x96xf32> -> vector<8x96xf32>
    %144 = arith.addf %143, %14 : vector<8x96xf32>
    %145 = arith.truncf %138 : vector<8x32xf32> to vector<8x32xbf16>
    %cst_41 = arith.constant dense<0.000000e+00> : vector<8x96xf32>
    %146 = tpu.matmul %145, %8, %cst_41 {dimension_numbers = #tpu.dot_dimension_numbers<[1], [0], [0], [1], [0, 0, 1, 1], [], []>} : vector<8x32xbf16>, vector<32x96xbf16>, vector<8x96xf32> -> vector<8x96xf32>
    %147 = arith.addf %146, %17 : vector<8x96xf32>
    %148 = vector.extract_strided_slice %144 {offsets = [0, 0], sizes = [8, 32], strides = [1, 1]} : vector<8x96xf32> to vector<8x32xf32>
    %149 = vector.extract_strided_slice %147 {offsets = [0, 0], sizes = [8, 32], strides = [1, 1]} : vector<8x96xf32> to vector<8x32xf32>
    %150 = arith.addf %148, %149 : vector<8x32xf32>
    %151 = arith.negf %150 : vector<8x32xf32>
    %152 = math.exp %151 : vector<8x32xf32>
    %cst_42 = arith.constant 1.000000e+00 : f32
    %153 = vector.broadcast %cst_42 : f32 to vector<8x32xf32>
    %154 = arith.addf %153, %152 : vector<8x32xf32>
    %155 = arith.divf %153, %154 : vector<8x32xf32>
    %156 = vector.extract_strided_slice %144 {offsets = [0, 32], sizes = [8, 32], strides = [1, 1]} : vector<8x96xf32> to vector<8x32xf32>
    %157 = vector.extract_strided_slice %147 {offsets = [0, 32], sizes = [8, 32], strides = [1, 1]} : vector<8x96xf32> to vector<8x32xf32>
    %158 = arith.addf %156, %157 : vector<8x32xf32>
    %159 = arith.negf %158 : vector<8x32xf32>
    %160 = math.exp %159 : vector<8x32xf32>
    %cst_43 = arith.constant 1.000000e+00 : f32
    %161 = vector.broadcast %cst_43 : f32 to vector<8x32xf32>
    %162 = arith.addf %161, %160 : vector<8x32xf32>
    %163 = arith.divf %161, %162 : vector<8x32xf32>
    %164 = vector.extract_strided_slice %144 {offsets = [0, 64], sizes = [8, 32], strides = [1, 1]} : vector<8x96xf32> to vector<8x32xf32>
    %165 = vector.extract_strided_slice %147 {offsets = [0, 64], sizes = [8, 32], strides = [1, 1]} : vector<8x96xf32> to vector<8x32xf32>
    %166 = arith.mulf %155, %165 : vector<8x32xf32>
    %167 = arith.addf %164, %166 : vector<8x32xf32>
    %168 = math.tanh %167 : vector<8x32xf32>
    %cst_44 = arith.constant 1.000000e+00 : f32
    %169 = vector.broadcast %cst_44 : f32 to vector<8x32xf32>
    %170 = arith.subf %169, %163 : vector<8x32xf32>
    %171 = arith.mulf %170, %168 : vector<8x32xf32>
    %172 = arith.mulf %163, %138 : vector<8x32xf32>
    %173 = arith.addf %171, %172 : vector<8x32xf32>
    %174 = vector.broadcast %c3_i32 : i32 to vector<8x1xi32>
    %175 = arith.cmpi slt, %174, %0 : vector<8x1xi32>
    %176 = vector.shape_cast %175 : vector<8x1xi1> to vector<8x1xi1>
    %177 = vector.broadcast %176 : vector<8x1xi1> to vector<8x32xi1>
    %178 = arith.select %177, %173, %138 : vector<8x32xi1>, vector<8x32xf32>
    %c4_i32 = arith.constant 4 : i32
    %179 = arith.index_cast %c4_i32 : i32 to index
    %c0_45 = arith.constant 0 : index
    %c0_46 = arith.constant 0 : index
    %180 = vector.load %arg3[%179, %c0_45, %c0_46] : memref<8x8x32xf32, #tpu.memory_space<vmem>>, vector<1x8x32xf32>
    %181 = vector.shape_cast %180 : vector<1x8x32xf32> to vector<8x32xf32>
    %182 = arith.truncf %181 : vector<8x32xf32> to vector<8x32xbf16>
    %cst_47 = arith.constant dense<0.000000e+00> : vector<8x96xf32>
    %183 = tpu.matmul %182, %6, %cst_47 {dimension_numbers = #tpu.dot_dimension_numbers<[1], [0], [0], [1], [0, 0, 1, 1], [], []>} : vector<8x32xbf16>, vector<32x96xbf16>, vector<8x96xf32> -> vector<8x96xf32>
    %184 = arith.addf %183, %14 : vector<8x96xf32>
    %185 = arith.truncf %178 : vector<8x32xf32> to vector<8x32xbf16>
    %cst_48 = arith.constant dense<0.000000e+00> : vector<8x96xf32>
    %186 = tpu.matmul %185, %8, %cst_48 {dimension_numbers = #tpu.dot_dimension_numbers<[1], [0], [0], [1], [0, 0, 1, 1], [], []>} : vector<8x32xbf16>, vector<32x96xbf16>, vector<8x96xf32> -> vector<8x96xf32>
    %187 = arith.addf %186, %17 : vector<8x96xf32>
    %188 = vector.extract_strided_slice %184 {offsets = [0, 0], sizes = [8, 32], strides = [1, 1]} : vector<8x96xf32> to vector<8x32xf32>
    %189 = vector.extract_strided_slice %187 {offsets = [0, 0], sizes = [8, 32], strides = [1, 1]} : vector<8x96xf32> to vector<8x32xf32>
    %190 = arith.addf %188, %189 : vector<8x32xf32>
    %191 = arith.negf %190 : vector<8x32xf32>
    %192 = math.exp %191 : vector<8x32xf32>
    %cst_49 = arith.constant 1.000000e+00 : f32
    %193 = vector.broadcast %cst_49 : f32 to vector<8x32xf32>
    %194 = arith.addf %193, %192 : vector<8x32xf32>
    %195 = arith.divf %193, %194 : vector<8x32xf32>
    %196 = vector.extract_strided_slice %184 {offsets = [0, 32], sizes = [8, 32], strides = [1, 1]} : vector<8x96xf32> to vector<8x32xf32>
    %197 = vector.extract_strided_slice %187 {offsets = [0, 32], sizes = [8, 32], strides = [1, 1]} : vector<8x96xf32> to vector<8x32xf32>
    %198 = arith.addf %196, %197 : vector<8x32xf32>
    %199 = arith.negf %198 : vector<8x32xf32>
    %200 = math.exp %199 : vector<8x32xf32>
    %cst_50 = arith.constant 1.000000e+00 : f32
    %201 = vector.broadcast %cst_50 : f32 to vector<8x32xf32>
    %202 = arith.addf %201, %200 : vector<8x32xf32>
    %203 = arith.divf %201, %202 : vector<8x32xf32>
    %204 = vector.extract_strided_slice %184 {offsets = [0, 64], sizes = [8, 32], strides = [1, 1]} : vector<8x96xf32> to vector<8x32xf32>
    %205 = vector.extract_strided_slice %187 {offsets = [0, 64], sizes = [8, 32], strides = [1, 1]} : vector<8x96xf32> to vector<8x32xf32>
    %206 = arith.mulf %195, %205 : vector<8x32xf32>
    %207 = arith.addf %204, %206 : vector<8x32xf32>
    %208 = math.tanh %207 : vector<8x32xf32>
    %cst_51 = arith.constant 1.000000e+00 : f32
    %209 = vector.broadcast %cst_51 : f32 to vector<8x32xf32>
    %210 = arith.subf %209, %203 : vector<8x32xf32>
    %211 = arith.mulf %210, %208 : vector<8x32xf32>
    %212 = arith.mulf %203, %178 : vector<8x32xf32>
    %213 = arith.addf %211, %212 : vector<8x32xf32>
    %214 = vector.broadcast %c4_i32 : i32 to vector<8x1xi32>
    %215 = arith.cmpi slt, %214, %0 : vector<8x1xi32>
    %216 = vector.shape_cast %215 : vector<8x1xi1> to vector<8x1xi1>
    %217 = vector.broadcast %216 : vector<8x1xi1> to vector<8x32xi1>
    %218 = arith.select %217, %213, %178 : vector<8x32xi1>, vector<8x32xf32>
    %c5_i32 = arith.constant 5 : i32
    %219 = arith.index_cast %c5_i32 : i32 to index
    %c0_52 = arith.constant 0 : index
    %c0_53 = arith.constant 0 : index
    %220 = vector.load %arg3[%219, %c0_52, %c0_53] : memref<8x8x32xf32, #tpu.memory_space<vmem>>, vector<1x8x32xf32>
    %221 = vector.shape_cast %220 : vector<1x8x32xf32> to vector<8x32xf32>
    %222 = arith.truncf %221 : vector<8x32xf32> to vector<8x32xbf16>
    %cst_54 = arith.constant dense<0.000000e+00> : vector<8x96xf32>
    %223 = tpu.matmul %222, %6, %cst_54 {dimension_numbers = #tpu.dot_dimension_numbers<[1], [0], [0], [1], [0, 0, 1, 1], [], []>} : vector<8x32xbf16>, vector<32x96xbf16>, vector<8x96xf32> -> vector<8x96xf32>
    %224 = arith.addf %223, %14 : vector<8x96xf32>
    %225 = arith.truncf %218 : vector<8x32xf32> to vector<8x32xbf16>
    %cst_55 = arith.constant dense<0.000000e+00> : vector<8x96xf32>
    %226 = tpu.matmul %225, %8, %cst_55 {dimension_numbers = #tpu.dot_dimension_numbers<[1], [0], [0], [1], [0, 0, 1, 1], [], []>} : vector<8x32xbf16>, vector<32x96xbf16>, vector<8x96xf32> -> vector<8x96xf32>
    %227 = arith.addf %226, %17 : vector<8x96xf32>
    %228 = vector.extract_strided_slice %224 {offsets = [0, 0], sizes = [8, 32], strides = [1, 1]} : vector<8x96xf32> to vector<8x32xf32>
    %229 = vector.extract_strided_slice %227 {offsets = [0, 0], sizes = [8, 32], strides = [1, 1]} : vector<8x96xf32> to vector<8x32xf32>
    %230 = arith.addf %228, %229 : vector<8x32xf32>
    %231 = arith.negf %230 : vector<8x32xf32>
    %232 = math.exp %231 : vector<8x32xf32>
    %cst_56 = arith.constant 1.000000e+00 : f32
    %233 = vector.broadcast %cst_56 : f32 to vector<8x32xf32>
    %234 = arith.addf %233, %232 : vector<8x32xf32>
    %235 = arith.divf %233, %234 : vector<8x32xf32>
    %236 = vector.extract_strided_slice %224 {offsets = [0, 32], sizes = [8, 32], strides = [1, 1]} : vector<8x96xf32> to vector<8x32xf32>
    %237 = vector.extract_strided_slice %227 {offsets = [0, 32], sizes = [8, 32], strides = [1, 1]} : vector<8x96xf32> to vector<8x32xf32>
    %238 = arith.addf %236, %237 : vector<8x32xf32>
    %239 = arith.negf %238 : vector<8x32xf32>
    %240 = math.exp %239 : vector<8x32xf32>
    %cst_57 = arith.constant 1.000000e+00 : f32
    %241 = vector.broadcast %cst_57 : f32 to vector<8x32xf32>
    %242 = arith.addf %241, %240 : vector<8x32xf32>
    %243 = arith.divf %241, %242 : vector<8x32xf32>
    %244 = vector.extract_strided_slice %224 {offsets = [0, 64], sizes = [8, 32], strides = [1, 1]} : vector<8x96xf32> to vector<8x32xf32>
    %245 = vector.extract_strided_slice %227 {offsets = [0, 64], sizes = [8, 32], strides = [1, 1]} : vector<8x96xf32> to vector<8x32xf32>
    %246 = arith.mulf %235, %245 : vector<8x32xf32>
    %247 = arith.addf %244, %246 : vector<8x32xf32>
    %248 = math.tanh %247 : vector<8x32xf32>
    %cst_58 = arith.constant 1.000000e+00 : f32
    %249 = vector.broadcast %cst_58 : f32 to vector<8x32xf32>
    %250 = arith.subf %249, %243 : vector<8x32xf32>
    %251 = arith.mulf %250, %248 : vector<8x32xf32>
    %252 = arith.mulf %243, %218 : vector<8x32xf32>
    %253 = arith.addf %251, %252 : vector<8x32xf32>
    %254 = vector.broadcast %c5_i32 : i32 to vector<8x1xi32>
    %255 = arith.cmpi slt, %254, %0 : vector<8x1xi32>
    %256 = vector.shape_cast %255 : vector<8x1xi1> to vector<8x1xi1>
    %257 = vector.broadcast %256 : vector<8x1xi1> to vector<8x32xi1>
    %258 = arith.select %257, %253, %218 : vector<8x32xi1>, vector<8x32xf32>
    %c6_i32 = arith.constant 6 : i32
    %259 = arith.index_cast %c6_i32 : i32 to index
    %c0_59 = arith.constant 0 : index
    %c0_60 = arith.constant 0 : index
    %260 = vector.load %arg3[%259, %c0_59, %c0_60] : memref<8x8x32xf32, #tpu.memory_space<vmem>>, vector<1x8x32xf32>
    %261 = vector.shape_cast %260 : vector<1x8x32xf32> to vector<8x32xf32>
    %262 = arith.truncf %261 : vector<8x32xf32> to vector<8x32xbf16>
    %cst_61 = arith.constant dense<0.000000e+00> : vector<8x96xf32>
    %263 = tpu.matmul %262, %6, %cst_61 {dimension_numbers = #tpu.dot_dimension_numbers<[1], [0], [0], [1], [0, 0, 1, 1], [], []>} : vector<8x32xbf16>, vector<32x96xbf16>, vector<8x96xf32> -> vector<8x96xf32>
    %264 = arith.addf %263, %14 : vector<8x96xf32>
    %265 = arith.truncf %258 : vector<8x32xf32> to vector<8x32xbf16>
    %cst_62 = arith.constant dense<0.000000e+00> : vector<8x96xf32>
    %266 = tpu.matmul %265, %8, %cst_62 {dimension_numbers = #tpu.dot_dimension_numbers<[1], [0], [0], [1], [0, 0, 1, 1], [], []>} : vector<8x32xbf16>, vector<32x96xbf16>, vector<8x96xf32> -> vector<8x96xf32>
    %267 = arith.addf %266, %17 : vector<8x96xf32>
    %268 = vector.extract_strided_slice %264 {offsets = [0, 0], sizes = [8, 32], strides = [1, 1]} : vector<8x96xf32> to vector<8x32xf32>
    %269 = vector.extract_strided_slice %267 {offsets = [0, 0], sizes = [8, 32], strides = [1, 1]} : vector<8x96xf32> to vector<8x32xf32>
    %270 = arith.addf %268, %269 : vector<8x32xf32>
    %271 = arith.negf %270 : vector<8x32xf32>
    %272 = math.exp %271 : vector<8x32xf32>
    %cst_63 = arith.constant 1.000000e+00 : f32
    %273 = vector.broadcast %cst_63 : f32 to vector<8x32xf32>
    %274 = arith.addf %273, %272 : vector<8x32xf32>
    %275 = arith.divf %273, %274 : vector<8x32xf32>
    %276 = vector.extract_strided_slice %264 {offsets = [0, 32], sizes = [8, 32], strides = [1, 1]} : vector<8x96xf32> to vector<8x32xf32>
    %277 = vector.extract_strided_slice %267 {offsets = [0, 32], sizes = [8, 32], strides = [1, 1]} : vector<8x96xf32> to vector<8x32xf32>
    %278 = arith.addf %276, %277 : vector<8x32xf32>
    %279 = arith.negf %278 : vector<8x32xf32>
    %280 = math.exp %279 : vector<8x32xf32>
    %cst_64 = arith.constant 1.000000e+00 : f32
    %281 = vector.broadcast %cst_64 : f32 to vector<8x32xf32>
    %282 = arith.addf %281, %280 : vector<8x32xf32>
    %283 = arith.divf %281, %282 : vector<8x32xf32>
    %284 = vector.extract_strided_slice %264 {offsets = [0, 64], sizes = [8, 32], strides = [1, 1]} : vector<8x96xf32> to vector<8x32xf32>
    %285 = vector.extract_strided_slice %267 {offsets = [0, 64], sizes = [8, 32], strides = [1, 1]} : vector<8x96xf32> to vector<8x32xf32>
    %286 = arith.mulf %275, %285 : vector<8x32xf32>
    %287 = arith.addf %284, %286 : vector<8x32xf32>
    %288 = math.tanh %287 : vector<8x32xf32>
    %cst_65 = arith.constant 1.000000e+00 : f32
    %289 = vector.broadcast %cst_65 : f32 to vector<8x32xf32>
    %290 = arith.subf %289, %283 : vector<8x32xf32>
    %291 = arith.mulf %290, %288 : vector<8x32xf32>
    %292 = arith.mulf %283, %258 : vector<8x32xf32>
    %293 = arith.addf %291, %292 : vector<8x32xf32>
    %294 = vector.broadcast %c6_i32 : i32 to vector<8x1xi32>
    %295 = arith.cmpi slt, %294, %0 : vector<8x1xi32>
    %296 = vector.shape_cast %295 : vector<8x1xi1> to vector<8x1xi1>
    %297 = vector.broadcast %296 : vector<8x1xi1> to vector<8x32xi1>
    %298 = arith.select %297, %293, %258 : vector<8x32xi1>, vector<8x32xf32>
    %c7_i32 = arith.constant 7 : i32
    %299 = arith.index_cast %c7_i32 : i32 to index
    %c0_66 = arith.constant 0 : index
    %c0_67 = arith.constant 0 : index
    %300 = vector.load %arg3[%299, %c0_66, %c0_67] : memref<8x8x32xf32, #tpu.memory_space<vmem>>, vector<1x8x32xf32>
    %301 = vector.shape_cast %300 : vector<1x8x32xf32> to vector<8x32xf32>
    %302 = arith.truncf %301 : vector<8x32xf32> to vector<8x32xbf16>
    %cst_68 = arith.constant dense<0.000000e+00> : vector<8x96xf32>
    %303 = tpu.matmul %302, %6, %cst_68 {dimension_numbers = #tpu.dot_dimension_numbers<[1], [0], [0], [1], [0, 0, 1, 1], [], []>} : vector<8x32xbf16>, vector<32x96xbf16>, vector<8x96xf32> -> vector<8x96xf32>
    %304 = arith.addf %303, %14 : vector<8x96xf32>
    %305 = arith.truncf %298 : vector<8x32xf32> to vector<8x32xbf16>
    %cst_69 = arith.constant dense<0.000000e+00> : vector<8x96xf32>
    %306 = tpu.matmul %305, %8, %cst_69 {dimension_numbers = #tpu.dot_dimension_numbers<[1], [0], [0], [1], [0, 0, 1, 1], [], []>} : vector<8x32xbf16>, vector<32x96xbf16>, vector<8x96xf32> -> vector<8x96xf32>
    %307 = arith.addf %306, %17 : vector<8x96xf32>
    %308 = vector.extract_strided_slice %304 {offsets = [0, 0], sizes = [8, 32], strides = [1, 1]} : vector<8x96xf32> to vector<8x32xf32>
    %309 = vector.extract_strided_slice %307 {offsets = [0, 0], sizes = [8, 32], strides = [1, 1]} : vector<8x96xf32> to vector<8x32xf32>
    %310 = arith.addf %308, %309 : vector<8x32xf32>
    %311 = arith.negf %310 : vector<8x32xf32>
    %312 = math.exp %311 : vector<8x32xf32>
    %cst_70 = arith.constant 1.000000e+00 : f32
    %313 = vector.broadcast %cst_70 : f32 to vector<8x32xf32>
    %314 = arith.addf %313, %312 : vector<8x32xf32>
    %315 = arith.divf %313, %314 : vector<8x32xf32>
    %316 = vector.extract_strided_slice %304 {offsets = [0, 32], sizes = [8, 32], strides = [1, 1]} : vector<8x96xf32> to vector<8x32xf32>
    %317 = vector.extract_strided_slice %307 {offsets = [0, 32], sizes = [8, 32], strides = [1, 1]} : vector<8x96xf32> to vector<8x32xf32>
    %318 = arith.addf %316, %317 : vector<8x32xf32>
    %319 = arith.negf %318 : vector<8x32xf32>
    %320 = math.exp %319 : vector<8x32xf32>
    %cst_71 = arith.constant 1.000000e+00 : f32
    %321 = vector.broadcast %cst_71 : f32 to vector<8x32xf32>
    %322 = arith.addf %321, %320 : vector<8x32xf32>
    %323 = arith.divf %321, %322 : vector<8x32xf32>
    %324 = vector.extract_strided_slice %304 {offsets = [0, 64], sizes = [8, 32], strides = [1, 1]} : vector<8x96xf32> to vector<8x32xf32>
    %325 = vector.extract_strided_slice %307 {offsets = [0, 64], sizes = [8, 32], strides = [1, 1]} : vector<8x96xf32> to vector<8x32xf32>
    %326 = arith.mulf %315, %325 : vector<8x32xf32>
    %327 = arith.addf %324, %326 : vector<8x32xf32>
    %328 = math.tanh %327 : vector<8x32xf32>
    %cst_72 = arith.constant 1.000000e+00 : f32
    %329 = vector.broadcast %cst_72 : f32 to vector<8x32xf32>
    %330 = arith.subf %329, %323 : vector<8x32xf32>
    %331 = arith.mulf %330, %328 : vector<8x32xf32>
    %332 = arith.mulf %323, %298 : vector<8x32xf32>
    %333 = arith.addf %331, %332 : vector<8x32xf32>
    %334 = vector.broadcast %c7_i32 : i32 to vector<8x1xi32>
    %335 = arith.cmpi slt, %334, %0 : vector<8x1xi32>
    %336 = vector.shape_cast %335 : vector<8x1xi1> to vector<8x1xi1>
    %337 = vector.broadcast %336 : vector<8x1xi1> to vector<8x32xi1>
    %338 = arith.select %337, %333, %298 : vector<8x32xi1>, vector<8x32xf32>
    %c8_i32 = arith.constant 8 : i32
    %c0_73 = arith.constant 0 : index
    %c0_74 = arith.constant 0 : index
    %339 = vector.load %arg9[%c0_73, %c0_74] : memref<8x32xf32, #tpu.memory_space<vmem>>, vector<8x32xf32>
    tpu.vector_store %arg9[%c0_73, %c0_74], %338 {strides = array<i32>} : memref<8x32xf32, #tpu.memory_space<vmem>>, vector<8x32xf32>,
    return
  }
  func.func @transform_0(%arg0: i32) -> (i32, i32) {
    %c0_i32 = arith.constant 0 : i32
    %c0_i32_0 = arith.constant 0 : i32
    return %arg0, %c0_i32 : i32, i32
  }
  func.func @transform_1(%arg0: i32) -> (i32, i32) {
    %c0_i32 = arith.constant 0 : i32
    %c0_i32_0 = arith.constant 0 : i32
    return %arg0, %c0_i32 : i32, i32
  }
  func.func @transform_2(%arg0: i32) -> (i32, i32, i32) {
    %c0_i32 = arith.constant 0 : i32
    %c0_i32_0 = arith.constant 0 : i32
    %c0_i32_1 = arith.constant 0 : i32
    return %c0_i32, %arg0, %c0_i32_0 : i32, i32, i32
  }
  func.func @transform_3(%arg0: i32) -> (i32, i32) {
    %c0_i32 = arith.constant 0 : i32
    %c0_i32_0 = arith.constant 0 : i32
    return %arg0, %c0_i32 : i32, i32
  }
  func.func @transform_4(%arg0: i32) -> (i32, i32) {
    %c0_i32 = arith.constant 0 : i32
    %c0_i32_0 = arith.constant 0 : i32
    %c0_i32_1 = arith.constant 0 : i32
    return %c0_i32, %c0_i32_0 : i32, i32
  }
  func.func @transform_5(%arg0: i32) -> (i32, i32) {
    %c0_i32 = arith.constant 0 : i32
    %c0_i32_0 = arith.constant 0 : i32
    %c0_i32_1 = arith.constant 0 : i32
    return %c0_i32, %c0_i32_0 : i32, i32
  }
  func.func @transform_6(%arg0: i32) -> (i32, i32) {
    %c0_i32 = arith.constant 0 : i32
    %c0_i32_0 = arith.constant 0 : i32
    %c0_i32_1 = arith.constant 0 : i32
    return %c0_i32, %c0_i32_0 : i32, i32
  }
  func.func @transform_7(%arg0: i32) -> (i32, i32) {
    %c0_i32 = arith.constant 0 : i32
    %c0_i32_0 = arith.constant 0 : i32
    %c0_i32_1 = arith.constant 0 : i32
    return %c0_i32, %c0_i32_0 : i32, i32
  }
  func.func @transform_8(%arg0: i32) -> (i32, i32) {
    %c0_i32 = arith.constant 0 : i32
    %c0_i32_0 = arith.constant 0 : i32
    return %arg0, %c0_i32 : i32, i32
  }
}

</mosaic_0001>

<bundles_post_ra>
// kernel: evolvenet_forward.1
= control target key start
LH: loop header
LB: loop body
LE: loop exit
PB: predicated region body
PF: predicated region fallthrough
CT: control target
= control target key end

     0   :  { %v1552_v1 = vmov 0.0   ;;  %vm1553_vm0 = vmmov 0   ;;  %v1554_v8 = vmov 0   ;;  %vm64_vm1 = vcmask 261120   ;;  %s1899_s0 = inlined_call_operand.vmem [shape: f32[8,32], index: 0, kind: input, shape index: {}]   ;;  %s1900_s1 = inlined_call_operand.vmem [shape: f32[8,32], index: 1, kind: input, shape index: {}]   ;;  %s1901_s2 = inlined_call_operand.vmem [shape: f32[8,8,32], index: 2, kind: input, shape index: {}]   ;;  %s1902_s3 = inlined_call_operand.vmem [shape: s32[8,1], index: 3, kind: input, shape index: {}]   ;;  %s1903_s4 = inlined_call_operand.vmem [shape: bf16[96,96], index: 4, kind: input, shape index: {}]   ;;  %s1904_s5 = inlined_call_operand.vmem [shape: bf16[32,96], index: 5, kind: input, shape index: {}]   ;;  %s1905_s6 = inlined_call_operand.vmem [shape: f32[1,96], index: 6, kind: input, shape index: {}]   ;;  %s1906_s7 = inlined_call_operand.vmem [shape: f32[1,96], index: 7, kind: input, shape index: {}]   ;;  %s1907_s8 = inlined_call_operand.hbm [shape: f32[8,32], index: 8, kind: output, shape index: {}]  }
   0x1   :  { %v1472_v0 = vld [vmem:[%s1903_s4 + $0x20] sm:$0xff]   ;;  %1320 = vmatprep.subr.bf16.mxu0 %v1552_v1  ;;  %1328 = vmatprep.subr.bf16.mxu1 %v1552_v1  ;;  %v1474_v3 = vld [vmem:[%s1903_s4 + $0x28] sm:$0xff]   ;;  %v1634_v10 = vld [vmem:[%s1903_s4 + $0x10] sm:$0xff]  }
   0x2   :  { %v1473_v2 = vld [vmem:[%s1903_s4] sm:$0xff]   ;;  %1321 = vmatpush3.bf16.msra.mxu0 %v1472_v0  ;;  %1324 = vmatprep.mubr.msk.bf16.mxu0 %vm1553_vm0, %v1552_v1  ;;  %v1475_v4 = vld [vmem:[%s1903_s4 + $0x8] sm:$0xff]   ;;  %v1649_v12 = vld [vmem:[%s1903_s4 + $0x18] sm:$0xff]  }
   0x3   :  { %1329 = vmatpush3.bf16.msra.mxu1 %v1473_v2  ;;  %1322 = vmatprep.subr.bf16.mxu0 %v1552_v1  ;;  %v34_v5 = vld [vmem:[%s1900_s1] sm:$0xff]  ;;  %v1659_v14 = vld [vmem:[%s1904_s5 + $0x8] sm:$0xff]  }
   0x4   :  { %1330 = vmatprep.subr.bf16.mxu1 %v1552_v1  ;;  %1332 = vmatprep.mubr.msk.bf16.mxu1 %vm1553_vm0, %v1552_v1  ;;  %v32_v6 = vld [vmem:[%s1899_s0] sm:$0xff]  ;;  %v35_v7 = vpack.c.bf16 %v34_v5, %v34_v5 }
   0x5   :  { %1470 = vset.pattern.permute.xlu1 %v1554_v8  ;;  %1471 = vset.pattern.permute.xlu0 %v1554_v8  ;;  %v33_v9 = vpack.c.bf16 %v32_v6, %v32_v6  ;;  %v1640_v11 = vld [vmem:[%s1904_s5] sm:$0xff]  }
   0x6   :  { %1323 = vmatpush3.bf16.msra.mxu0 %v1474_v3  ;;  %v178_v13 = vld [vmem:[%s1901_s2] sm:$0xff] }
   0x7   :  { %1331 = vmatpush3.bf16.msra.mxu1 %v1475_v4  ;;  %1336 = vmatprep.subr.bf16.mxu0 %v1552_v1 }
   0x8   :  { %1344 = vmatprep.subr.bf16.mxu1 %v1552_v1 }
   0x9   :  { %1325 = vmatmul.mubr.msk.bf16.vlgmr.msra.gmra.mrb[0].mxu0 %vm64_vm1, %v35_v7 }
   0xa   :  { %1333 = vmatmul.mubr.msk.bf16.vlgmr.msra.gmra.mrb[0].mxu1 %vm64_vm1, %v33_v9  ;;  %1337 = vmatpush3.bf16.msra.mxu0 %v1634_v10 }
   0xb   :  { %1345 = vmatpush3.bf16.msra.mxu1 %v1640_v11  ;;  %1338 = vmatprep.subr.bf16.mxu0 %v1552_v1 }
   0xc   :  { %13 = vsyncpa [#allocation3], 0  ;;  %1346 = vmatprep.subr.bf16.mxu1 %v1552_v1  ;;  %1340 = vmatprep.mubr.msk.bf16.mxu0 %vm1553_vm0, %v1552_v1  ;;  %v179_v15 = vpack.c.bf16 %v178_v13, %v178_v13  ;;  %v1238_v16 = vld [vmem:[%s1901_s2 + $0x8] sm:$0xff]  ;;  %v1242_v18 = vld [vmem:[%s1901_s2 + $0x10] sm:$0xff] }
   0xd   :  { %1348 = vmatprep.mubr.msk.bf16.mxu1 %vm1553_vm0, %v1552_v1  ;;  %v325_v17 = vpack.c.bf16 %v1238_v16, %v1238_v16  ;;  %v451_v19 = vpack.c.bf16 %v1242_v18, %v1242_v18  ;;  %v1246_v20 = vld [vmem:[%s1901_s2 + $0x18] sm:$0xff]  ;;  %v1250_v22 = vld [vmem:[%s1901_s2 + $0x20] sm:$0xff]  ;;  %v1254_v24 = vld [vmem:[%s1901_s2 + $0x28] sm:$0xff] }
   0xe   :  { %1339 = vmatpush3.bf16.msra.mxu0 %v1649_v12  ;;  %v577_v21 = vpack.c.bf16 %v1246_v20, %v1246_v20  ;;  %v703_v23 = vpack.c.bf16 %v1250_v22, %v1250_v22  ;;  %v829_v25 = vpack.c.bf16 %v1254_v24, %v1254_v24  ;;  %v1258_v26 = vld [vmem:[%s1901_s2 + $0x30] sm:$0xff]  ;;  %v1262_v28 = vld [vmem:[%s1901_s2 + $0x38] sm:$0xff]  ;;  %v1750_v33 = vld [vmem:[%s1902_s3] sm:$0xff]  ;;  %s1555_s3 = smov 64  }
   0xf   :  { %1347 = vmatpush3.bf16.msra.mxu1 %v1659_v14  ;;  %1352 = vmatprep.subr.bf16.mxu0 %v1552_v1  ;;  %v955_v27 = vpack.c.bf16 %v1258_v26, %v1258_v26  ;;  %v1081_v29 = vpack.c.bf16 %v1262_v28, %v1262_v28  ;;  %vm316_vm2 = vcmp.gt.s32.totalorder %v1750_v33, 0  ;;  %v1230_v40 = vld [vmem:[%s1905_s6] ss:$0 sm:$0xff]  ;;  %s1556_s6 = smov 96   ;;  %vm442_vm4 = vcmp.gt.s32.totalorder %v1750_v33, 1 }
  0x10   :  { %1360 = vmatprep.subr.bf16.mxu1 %v1552_v1  ;;  %v317_v39 = vsel %vm316_vm2, 1, %v1554_v8  ;;  %v1760_v43 = vld [vmem:[%s1906_s7] ss:$0 sm:$0xff]  ;;  %vm568_vm6 = vcmp.gt.s32.totalorder %v1750_v33, 2  ;;  %vm694_vm8 = vcmp.gt.s32.totalorder %v1750_v33, 3  ;;  %vm820_vm10 = vcmp.gt.s32.totalorder %v1750_v33, 4 }
  0x11   :  { %1341 = vmatmul.mubr.msk.bf16.vlgmr.msra.gmra.mrb[4].mxu0 %vm64_vm1, %v179_v15  ;;  %319 = vperm.xlu1 %1470, %v317_v39   ;;  %vm946_vm12 = vcmp.gt.s32.totalorder %v1750_v33, 5  ;;  %vm1072_vm14 = vcmp.gt.s32.totalorder %v1750_v33, 6  ;;  %s1557_s7 = smov [#allocation2]  }
  0x12   :  { %1349 = vmatmul.mubr.bf16.vlgmr.msra.gmra.mrb[4].mxu1 %v1554_v8  ;;  %1353 = vmatpush3.bf16.msra.mxu0 %v1634_v10  ;;  %s1216_s19 = sshll.u32 %s1557_s7, 4  ;;  %s1217_s19 = int_to_ptr.vmem [resolvable:$true] %s1216_s19 }
  0x13   :  { %1354 = vmatprep.subr.bf16.mxu0 %v1552_v1  ;;  %1356 = vmatprep.mubr.msk.bf16.mxu0 %vm1553_vm0, %v1552_v1  ;;  %s1528_s0 = scalar_lea.vmem %s1217_s19, 128  ;;  %p1533_p1 = scmp.lt.s32.totalorder %s1217_s19, %s1217_s19 }
  0x14   :  { %1361 = vmatpush3.bf16.msra.mxu1 %v1640_v11  ;;  %1364 = vmatprep.mubr.msk.bf16.mxu1 %vm1553_vm0, %v1552_v1  ;;  %p1529_p0 = scmp.ne.s32.totalorder %s1217_s19, %s1528_s0  ;;  %p1534_p2 = scmp.lt.s32.totalorder %s1528_s0, %s1528_s0 }
  0x15   :  { %1362 = vmatprep.subr.bf16.mxu1 %v1552_v1 }
  0x16   :  { %1355 = vmatpush3.bf16.msra.mxu0 %v1649_v12  ;;  %p1535_p3 = por %p1534_p2, %p1533_p1 }
  0x17   :  { %1368 = vmatprep.subr.bf16.mxu0 %v1552_v1 }
  0x18   :  { %1363 = vmatpush3.bf16.msra.mxu1 %v1659_v14  ;;  %p1536_p4 = pnand %p1535_p3, %p1529_p0 }
  0x19   :  { %1357 = vmatmul.mubr.msk.bf16.vlgmr.msra.gmra.mrb[8].mxu0 %vm64_vm1, %v325_v17  ;;  %1376 = vmatprep.subr.bf16.mxu1 %v1552_v1 }
  0x1a   :  { %1369 = vmatpush3.bf16.msra.mxu0 %v1634_v10  ;;  %1372 = vmatprep.mubr.msk.bf16.mxu0 %vm1553_vm0, %v1552_v1 }
  0x1b   :  { %1370 = vmatprep.subr.bf16.mxu0 %v1552_v1 }
  0x1e   :  { %1371 = vmatpush3.bf16.msra.mxu0 %v1649_v12 }
  0x1f   :  { %1384 = vmatprep.subr.bf16.mxu0 %v1552_v1 }
  0x21   :  { %1373 = vmatmul.mubr.msk.bf16.vlgmr.msra.gmra.mrb[12].mxu0 %vm64_vm1, %v451_v19 }
  0x22   :  { %1385 = vmatpush3.bf16.msra.mxu0 %v1634_v10  ;;  %1388 = vmatprep.mubr.msk.bf16.mxu0 %vm1553_vm0, %v1552_v1 }
  0x23   :  { %1386 = vmatprep.subr.bf16.mxu0 %v1552_v1 }
  0x26   :  { %1387 = vmatpush3.bf16.msra.mxu0 %v1649_v12 }
  0x27   :  { %1400 = vmatprep.subr.bf16.mxu0 %v1552_v1 }
  0x29   :  { %1389 = vmatmul.mubr.msk.bf16.vlgmr.msra.gmra.mrb[16].mxu0 %vm64_vm1, %v577_v21 }
  0x2a   :  { %1401 = vmatpush3.bf16.msra.mxu0 %v1634_v10  ;;  %1404 = vmatprep.mubr.msk.bf16.mxu0 %vm1553_vm0, %v1552_v1 }
  0x2b   :  { %1402 = vmatprep.subr.bf16.mxu0 %v1552_v1 }
  0x2e   :  { %1403 = vmatpush3.bf16.msra.mxu0 %v1649_v12 }
  0x2f   :  { %1416 = vmatprep.subr.bf16.mxu0 %v1552_v1 }
  0x31   :  { %1405 = vmatmul.mubr.msk.bf16.vlgmr.msra.gmra.mrb[20].mxu0 %vm64_vm1, %v703_v23 }
  0x32   :  { %1417 = vmatpush3.bf16.msra.mxu0 %v1634_v10  ;;  %1420 = vmatprep.mubr.msk.bf16.mxu0 %vm1553_vm0, %v1552_v1 }
  0x33   :  { %1418 = vmatprep.subr.bf16.mxu0 %v1552_v1 }
  0x36   :  { %1419 = vmatpush3.bf16.msra.mxu0 %v1649_v12 }
  0x37   :  { %1432 = vmatprep.subr.bf16.mxu0 %v1552_v1 }
  0x39   :  { %1421 = vmatmul.mubr.msk.bf16.vlgmr.msra.gmra.mrb[24].mxu0 %vm64_vm1, %v829_v25 }
  0x3a   :  { %1433 = vmatpush3.bf16.msra.mxu0 %v1634_v10  ;;  %1436 = vmatprep.mubr.msk.bf16.mxu0 %vm1553_vm0, %v1552_v1 }
  0x3b   :  { %1434 = vmatprep.subr.bf16.mxu0 %v1552_v1 }
  0x3e   :  { %1435 = vmatpush3.bf16.msra.mxu0 %v1649_v12 }
  0x3f   :  { %1448 = vmatprep.subr.bf16.mxu0 %v1552_v1 }
  0x41   :  { %1437 = vmatmul.mubr.msk.bf16.vlgmr.msra.gmra.mrb[28].mxu0 %vm64_vm1, %v955_v27 }
  0x42   :  { %1449 = vmatpush3.bf16.msra.mxu0 %v1634_v10  ;;  %1452 = vmatprep.mubr.msk.bf16.mxu0 %vm1553_vm0, %v1552_v1 }
  0x43   :  { %1450 = vmatprep.subr.bf16.mxu0 %v1552_v1 }
  0x46   :  { %1451 = vmatpush3.bf16.msra.mxu0 %v1649_v12 }
  0x49   :  { %1453 = vmatmul.mubr.msk.bf16.vlgmr.msra.gmra.mrb[32].mxu0 %vm64_vm1, %v1081_v29 }
  0xdc   :  { %v102_v30 = vpop.f32.mrb[0].mxu0 }
  0xdd   :  { %v157_v31 = vpop.f32.mrb[0].mxu1  ;;  %v1326_v32 = vpop.f32.mrb[1].mxu0 }
  0xde   :  { %v158_v34 = vadd.f32 %v157_v31, %v102_v30  ;;  %v1334_v35 = vpop.f32.mrb[1].mxu1  ;;  %v105_v36 = vpop.f32.mrb[2].mxu0 }
  0xdf   :  { %v160_v37 = vpop.f32.mrb[2].mxu1  ;;  %v1327_v38 = vpop.f32.mrb[3].mxu0 }
  0xe0   :  { %v1335_v41 = vpop.f32.mrb[3].mxu1  ;;  %v170_v42 = vadd.f32 %v1230_v40, %v158_v34  ;;  %v320_v40 = vpop.permute.xlu1 %319 }
  0xe1   :  { %vm321_vm3 = vcmp.eq.s32.totalorder %v320_v40, 1 }
  0xe4   :  { %v229_v44 = vpop.f32.mrb[4].mxu0 }
  0xe5   :  { %v230_v45 = vadd.f32 %v229_v44, %v170_v42  ;;  %v284_v46 = vpop.f32.mrb[4].mxu1  ;;  %v1342_v47 = vpop.f32.mrb[5].mxu0 }
  0xe6   :  { %v285_v48 = vadd.f32 %v1760_v43, %v284_v46  ;;  %v1350_v49 = vpop.f32.mrb[5].mxu1  ;;  %v232_v50 = vpop.f32.mrb[6].mxu0 }
  0xe7   :  { %v287_v51 = vpop.f32.mrb[6].mxu1  ;;  %v1343_v52 = vpop.f32.mrb[7].mxu0 }
  0xe8   :  { %298 = vrot.lane.b32.xlu0 %v285_v48, %s1555_s3  ;;  %v1351_v53 = vpop.f32.mrb[7].mxu1  ;;  %v290_v29 = vadd.f32 %v285_v48, %v230_v45 }
  0xea   :  { %v1237_v30 = vmul.f32 -1.442695, %v290_v29 }
  0xec   :  { %v363_v54 = vpop.f32.mrb[8].mxu0  ;;  %1480 = vpow2.f32 %v1237_v30  ;;  %v569_v30 = vsel %vm568_vm6, 1, %v1554_v8 }
  0xed   :  { %v1764_v55 = vadd.f32 %v363_v54, %v170_v42  ;;  %v1358_v56 = vpop.f32.mrb[9].mxu0 }
  0xee   :  { %v366_v57 = vpop.f32.mrb[10].mxu0  ;;  %v443_v56 = vsel %vm442_vm4, 1, %v1554_v8 }
  0xef   :  { %v1359_v58 = vpop.f32.mrb[11].mxu0 }
  0xf4   :  { %v489_v59 = vpop.f32.mrb[12].mxu0 }
  0xf5   :  { %v1766_v60 = vadd.f32 %v489_v59, %v170_v42  ;;  %v1374_v61 = vpop.f32.mrb[13].mxu0 }
  0xf6   :  { %v492_v62 = vpop.f32.mrb[14].mxu0  ;;  %v1481_v31 = vpop.eup %1480 }
  0xf7   :  { %v1375_v63 = vpop.f32.mrb[15].mxu0  ;;  %v294_v32 = vadd.f32 1.0, %v1481_v31 }
  0xf9   :  { %1482 = vrcp.f32 %v294_v32 }
  0xfc   :  { %v615_v0 = vpop.f32.mrb[16].mxu0 }
  0xfd   :  { %v1768_v2 = vadd.f32 %v615_v0, %v170_v42  ;;  %v1390_v3 = vpop.f32.mrb[17].mxu0 }
  0xfe   :  { %v618_v4 = vpop.f32.mrb[18].mxu0 }
  0xff   :  { %v1391_v5 = vpop.f32.mrb[19].mxu0 }
 0x103   :  { %v1483_v34 = vpop.eup %1482 }
 0x104   :  { %v741_v6 = vpop.f32.mrb[20].mxu0  ;;  %v308_v41 = vsub.f32 1.0, %v1483_v34  ;;  %v314_v44 = vmul.f32 0.0, %v1483_v34 }
 0x105   :  { %v1770_v7 = vadd.f32 %v741_v6, %v170_v42  ;;  %v1406_v9 = vpop.f32.mrb[21].mxu0 }
 0x106   :  { %v744_v10 = vpop.f32.mrb[22].mxu0 }
 0x107   :  { %v1407_v12 = vpop.f32.mrb[23].mxu0 }
 0x10c   :  { %v867_v13 = vpop.f32.mrb[24].mxu0 }
 0x10d   :  { %v1772_v15 = vadd.f32 %v867_v13, %v170_v42  ;;  %v1422_v16 = vpop.f32.mrb[25].mxu0 }
 0x10e   :  { %v870_v17 = vpop.f32.mrb[26].mxu0 }
 0x10f   :  { %v1423_v18 = vpop.f32.mrb[27].mxu0 }
 0x114   :  { %v993_v19 = vpop.f32.mrb[28].mxu0 }
 0x115   :  { %v1774_v20 = vadd.f32 %v993_v19, %v170_v42  ;;  %v1438_v21 = vpop.f32.mrb[29].mxu0 }
 0x116   :  { %v996_v22 = vpop.f32.mrb[30].mxu0 }
 0x117   :  { %v1439_v23 = vpop.f32.mrb[31].mxu0 }
 0x11c   :  { %v1119_v24 = vpop.f32.mrb[32].mxu0 }
 0x11d   :  { %v1776_v25 = vadd.f32 %v1119_v24, %v170_v42  ;;  %v1454_v26 = vpop.f32.mrb[33].mxu0 }
 0x11e   :  { %v1122_v27 = vpop.f32.mrb[34].mxu0 }
 0x11f   :  { %v1455_v28 = vpop.f32.mrb[35].mxu0 }
 0x15a   :  { %v299_v35 = vpop.permute.xlu0 %298 }
 0x15b   :  { %v301_v36 = vmul.f32 %v1483_v34, %v299_v35 }
 0x15d   :  { %303 = vrot.lane.b32.xlu0 %v301_v36, %s1555_s3 }
 0x1cf   :  { %v304_v37 = vpop.permute.xlu0 %303 }
 0x1d0   :  { %v306_v38 = vadd.f32 %v304_v37, %v230_v45 }
 0x1d2   :  { %1484 = vtanh.f32 %v306_v38 }
 0x1dc   :  { %v1485_v39 = vpop.eup %1484 }
 0x1dd   :  { %310 = vrot.lane.b32.xlu1 %v1485_v39, %s1556_s6 }
 0x24f   :  { %v311_v42 = vpop.permute.xlu1 %310 }
 0x250   :  { %v313_v46 = vmul.f32 %v311_v42, %v308_v41 }
 0x252   :  { %v315_v47 = vadd.f32 %v314_v44, %v313_v46 }
 0x254   :  { %v322_v48 = vsel %vm321_vm3, %v315_v47, 0.0 }
 0x255   :  { %v369_v49 = vpack.c.bf16 %v322_v48, %v322_v48 }
 0x257   :  { %371 = vrot.lane.b32.xlu0 %v369_v49, %s1556_s6 }
 0x2c9   :  { %v372_v50 = vpop.permute.xlu0 %371 }
 0x2ca   :  { %1365 = vmatmul.mubr.msk.bf16.vlgmr.msra.gmra.mrb[8].mxu1 %vm64_vm1, %v372_v50 }
 0x2cb   :  { %1377 = vmatpush3.bf16.msra.mxu1 %v1640_v11  ;;  %1380 = vmatprep.mubr.msk.bf16.mxu1 %vm1553_vm0, %v1552_v1 }
 0x2cc   :  { %1378 = vmatprep.subr.bf16.mxu1 %v1552_v1 }
 0x2cf   :  { %1379 = vmatpush3.bf16.msra.mxu1 %v1659_v14 }
 0x2d0   :  { %1392 = vmatprep.subr.bf16.mxu1 %v1552_v1 }
 0x39d   :  { %v410_v45 = vpop.f32.mrb[8].mxu1 }
 0x39e   :  { %v411_v51 = vadd.f32 %v1760_v43, %v410_v45  ;;  %v1366_v52 = vpop.f32.mrb[9].mxu1 }
 0x39f   :  { %v413_v53 = vpop.f32.mrb[10].mxu1  ;;  %v695_v52 = vsel %vm694_vm8, 1, %v1554_v8 }
 0x3a0   :  { %424 = vrot.lane.b32.xlu1 %v411_v51, %s1555_s3  ;;  %v1367_v54 = vpop.f32.mrb[11].mxu1  ;;  %v416_v57 = vadd.f32 %v411_v51, %v1764_v55 }
 0x3a2   :  { %v1241_v58 = vmul.f32 -1.442695, %v416_v57 }
 0x3a4   :  { %445 = vperm.xlu1 %1470, %v443_v56   ;;  %1486 = vpow2.f32 %v1241_v58 }
 0x3ae   :  { %v1487_v59 = vpop.eup %1486 }
 0x3af   :  { %v420_v61 = vadd.f32 1.0, %v1487_v59 }
 0x3b1   :  { %1488 = vrcp.f32 %v420_v61 }
 0x3bb   :  { %v1489_v62 = vpop.eup %1488 }
 0x3bc   :  { %v434_v6 = vsub.f32 1.0, %v1489_v62  ;;  %v440_v12 = vmul.f32 %v1489_v62, %v322_v48 }
 0x412   :  { %v425_v63 = vpop.permute.xlu1 %424 }
 0x413   :  { %v427_v0 = vmul.f32 %v1489_v62, %v425_v63 }
 0x415   :  { %429 = vrot.lane.b32.xlu0 %v427_v0, %s1555_s3 }
 0x423   :  { %v446_v10 = vpop.permute.xlu1 %445 }
 0x424   :  { %vm447_vm5 = vcmp.eq.s32.totalorder %v446_v10, 1 }
 0x487   :  { %v430_v3 = vpop.permute.xlu0 %429 }
 0x488   :  { %v432_v4 = vadd.f32 %v430_v3, %v1764_v55 }
 0x48a   :  { %1490 = vtanh.f32 %v432_v4 }
 0x494   :  { %v1491_v5 = vpop.eup %1490 }
 0x495   :  { %436 = vrot.lane.b32.xlu0 %v1491_v5, %s1556_s6 }
 0x507   :  { %v437_v9 = vpop.permute.xlu0 %436 }
 0x508   :  { %v439_v13 = vmul.f32 %v437_v9, %v434_v6 }
 0x50a   :  { %v441_v16 = vadd.f32 %v440_v12, %v439_v13 }
 0x50c   :  { %v448_v17 = vsel %vm447_vm5, %v441_v16, %v322_v48 }
 0x50d   :  { %v495_v18 = vpack.c.bf16 %v448_v17, %v448_v17 }
 0x50f   :  { %497 = vrot.lane.b32.xlu1 %v495_v18, %s1556_s6 }
 0x581   :  { %v498_v19 = vpop.permute.xlu1 %497 }
 0x582   :  { %1381 = vmatmul.mubr.msk.bf16.vlgmr.msra.gmra.mrb[12].mxu1 %vm64_vm1, %v498_v19 }
 0x583   :  { %1393 = vmatpush3.bf16.msra.mxu1 %v1640_v11  ;;  %1396 = vmatprep.mubr.msk.bf16.mxu1 %vm1553_vm0, %v1552_v1 }
 0x584   :  { %1394 = vmatprep.subr.bf16.mxu1 %v1552_v1 }
 0x587   :  { %1395 = vmatpush3.bf16.msra.mxu1 %v1659_v14 }
 0x588   :  { %1408 = vmatprep.subr.bf16.mxu1 %v1552_v1 }
 0x655   :  { %v536_v55 = vpop.f32.mrb[12].mxu1 }
 0x656   :  { %v537_v21 = vadd.f32 %v1760_v43, %v536_v55  ;;  %v1382_v22 = vpop.f32.mrb[13].mxu1 }
 0x657   :  { %v539_v23 = vpop.f32.mrb[14].mxu1 }
 0x658   :  { %550 = vrot.lane.b32.xlu0 %v537_v21, %s1555_s3  ;;  %v1383_v24 = vpop.f32.mrb[15].mxu1  ;;  %v542_v26 = vadd.f32 %v537_v21, %v1766_v60  ;;  %v821_v21 = vsel %vm820_vm10, 1, %v1554_v8 }
 0x65a   :  { %v1245_v27 = vmul.f32 -1.442695, %v542_v26 }
 0x65c   :  { %1492 = vpow2.f32 %v1245_v27  ;;  %571 = vperm.xlu0 %1471, %v569_v30  }
 0x666   :  { %v1493_v28 = vpop.eup %1492 }
 0x667   :  { %v546_v29 = vadd.f32 1.0, %v1493_v28 }
 0x669   :  { %1494 = vrcp.f32 %v546_v29 }
 0x673   :  { %v1495_v31 = vpop.eup %1494 }
 0x674   :  { %v560_v38 = vsub.f32 1.0, %v1495_v31  ;;  %v566_v41 = vmul.f32 %v1495_v31, %v448_v17 }
 0x6ca   :  { %v551_v32 = vpop.permute.xlu0 %550 }
 0x6cb   :  { %v553_v34 = vmul.f32 %v1495_v31, %v551_v32 }
 0x6cd   :  { %555 = vrot.lane.b32.xlu1 %v553_v34, %s1555_s3 }
 0x6db   :  { %v572_v39 = vpop.permute.xlu0 %571 }
 0x6dc   :  { %vm573_vm7 = vcmp.eq.s32.totalorder %v572_v39, 1 }
 0x73f   :  { %v556_v35 = vpop.permute.xlu1 %555 }
 0x740   :  { %v558_v36 = vadd.f32 %v556_v35, %v1766_v60 }
 0x742   :  { %1496 = vtanh.f32 %v558_v36 }
 0x74c   :  { %v1497_v37 = vpop.eup %1496 }
 0x74d   :  { %562 = vrot.lane.b32.xlu1 %v1497_v37, %s1556_s6 }
 0x7bf   :  { %v563_v40 = vpop.permute.xlu1 %562 }
 0x7c0   :  { %v565_v42 = vmul.f32 %v563_v40, %v560_v38 }
 0x7c2   :  { %v567_v44 = vadd.f32 %v566_v41, %v565_v42 }
 0x7c4   :  { %v574_v46 = vsel %vm573_vm7, %v567_v44, %v448_v17 }
 0x7c5   :  { %v621_v47 = vpack.c.bf16 %v574_v46, %v574_v46 }
 0x7c7   :  { %623 = vrot.lane.b32.xlu1 %v621_v47, %s1556_s6 }
 0x839   :  { %v624_v48 = vpop.permute.xlu1 %623 }
 0x83a   :  { %1397 = vmatmul.mubr.msk.bf16.vlgmr.msra.gmra.mrb[16].mxu1 %vm64_vm1, %v624_v48 }
 0x83b   :  { %1409 = vmatpush3.bf16.msra.mxu1 %v1640_v11  ;;  %1412 = vmatprep.mubr.msk.bf16.mxu1 %vm1553_vm0, %v1552_v1 }
 0x83c   :  { %1410 = vmatprep.subr.bf16.mxu1 %v1552_v1 }
 0x83f   :  { %1411 = vmatpush3.bf16.msra.mxu1 %v1659_v14 }
 0x840   :  { %1424 = vmatprep.subr.bf16.mxu1 %v1552_v1 }
 0x90d   :  { %v662_v60 = vpop.f32.mrb[16].mxu1 }
 0x90e   :  { %v663_v49 = vadd.f32 %v1760_v43, %v662_v60  ;;  %v1398_v50 = vpop.f32.mrb[17].mxu1  ;;  %v947_v60 = vsel %vm946_vm12, 1, %v1554_v8 }
 0x90f   :  { %v665_v45 = vpop.f32.mrb[18].mxu1 }
 0x910   :  { %676 = vrot.lane.b32.xlu0 %v663_v49, %s1555_s3  ;;  %v1399_v51 = vpop.f32.mrb[19].mxu1  ;;  %v668_v53 = vadd.f32 %v663_v49, %v1768_v2 }
 0x912   :  { %v1249_v54 = vmul.f32 -1.442695, %v668_v53 }
 0x914   :  { %697 = vperm.xlu0 %1471, %v695_v52   ;;  %1498 = vpow2.f32 %v1249_v54 }
 0x91e   :  { %v1499_v56 = vpop.eup %1498 }
 0x91f   :  { %v672_v57 = vadd.f32 1.0, %v1499_v56 }
 0x921   :  { %1500 = vrcp.f32 %v672_v57 }
 0x92b   :  { %v1501_v58 = vpop.eup %1500 }
 0x92c   :  { %v686_v3 = vsub.f32 1.0, %v1501_v58  ;;  %v692_v6 = vmul.f32 %v1501_v58, %v574_v46 }
 0x982   :  { %v677_v59 = vpop.permute.xlu0 %676 }
 0x983   :  { %v679_v61 = vmul.f32 %v1501_v58, %v677_v59 }
 0x985   :  { %681 = vrot.lane.b32.xlu1 %v679_v61, %s1555_s3 }
 0x993   :  { %v698_v5 = vpop.permute.xlu0 %697 }
 0x994   :  { %vm699_vm9 = vcmp.eq.s32.totalorder %v698_v5, 1 }
 0x9f7   :  { %v682_v62 = vpop.permute.xlu1 %681 }
 0x9f8   :  { %v684_v63 = vadd.f32 %v682_v62, %v1768_v2 }
 0x9fa   :  { %1502 = vtanh.f32 %v684_v63 }
 0xa04   :  { %v1503_v0 = vpop.eup %1502 }
 0xa05   :  { %688 = vrot.lane.b32.xlu1 %v1503_v0, %s1556_s6 }
 0xa77   :  { %v689_v4 = vpop.permute.xlu1 %688 }
 0xa78   :  { %v691_v9 = vmul.f32 %v689_v4, %v686_v3 }
 0xa7a   :  { %v693_v10 = vadd.f32 %v692_v6, %v691_v9 }
 0xa7c   :  { %v700_v12 = vsel %vm699_vm9, %v693_v10, %v574_v46 }
 0xa7d   :  { %v747_v13 = vpack.c.bf16 %v700_v12, %v700_v12 }
 0xa7f   :  { %749 = vrot.lane.b32.xlu0 %v747_v13, %s1556_s6 }
 0xaf1   :  { %v750_v16 = vpop.permute.xlu0 %749 }
 0xaf2   :  { %1413 = vmatmul.mubr.msk.bf16.vlgmr.msra.gmra.mrb[20].mxu1 %vm64_vm1, %v750_v16  ;;  %v1073_v16 = vsel %vm1072_vm14, 1, %v1554_v8 }
 0xaf3   :  { %1425 = vmatpush3.bf16.msra.mxu1 %v1640_v11  ;;  %1428 = vmatprep.mubr.msk.bf16.mxu1 %vm1553_vm0, %v1552_v1 }
 0xaf4   :  { %1426 = vmatprep.subr.bf16.mxu1 %v1552_v1 }
 0xaf7   :  { %1427 = vmatpush3.bf16.msra.mxu1 %v1659_v14 }
 0xaf8   :  { %1440 = vmatprep.subr.bf16.mxu1 %v1552_v1 }
 0xbc5   :  { %v788_v2 = vpop.f32.mrb[20].mxu1 }
 0xbc6   :  { %v789_v17 = vadd.f32 %v1760_v43, %v788_v2  ;;  %v1414_v18 = vpop.f32.mrb[21].mxu1 }
 0xbc7   :  { %v791_v19 = vpop.f32.mrb[22].mxu1 }
 0xbc8   :  { %802 = vrot.lane.b32.xlu1 %v789_v17, %s1555_s3  ;;  %v1415_v55 = vpop.f32.mrb[23].mxu1  ;;  %v794_v22 = vadd.f32 %v789_v17, %v1770_v7 }
 0xbca   :  { %v1253_v23 = vmul.f32 -1.442695, %v794_v22 }
 0xbcc   :  { %823 = vperm.xlu1 %1470, %v821_v21   ;;  %1504 = vpow2.f32 %v1253_v23 }
 0xbd6   :  { %v1505_v24 = vpop.eup %1504 }
 0xbd7   :  { %v798_v26 = vadd.f32 1.0, %v1505_v24 }
 0xbd9   :  { %1506 = vrcp.f32 %v798_v26 }
 0xbe3   :  { %v1507_v27 = vpop.eup %1506 }
 0xbe4   :  { %v812_v34 = vsub.f32 1.0, %v1507_v27  ;;  %v818_v37 = vmul.f32 %v1507_v27, %v700_v12 }
 0xc3a   :  { %v803_v28 = vpop.permute.xlu1 %802 }
 0xc3b   :  { %v805_v29 = vmul.f32 %v1507_v27, %v803_v28 }
 0xc3d   :  { %807 = vrot.lane.b32.xlu0 %v805_v29, %s1555_s3 }
 0xc4b   :  { %v824_v36 = vpop.permute.xlu1 %823 }
 0xc4c   :  { %vm825_vm11 = vcmp.eq.s32.totalorder %v824_v36, 1 }
 0xcaf   :  { %v808_v30 = vpop.permute.xlu0 %807 }
 0xcb0   :  { %v810_v31 = vadd.f32 %v808_v30, %v1770_v7 }
 0xcb2   :  { %1508 = vtanh.f32 %v810_v31 }
 0xcbc   :  { %v1509_v32 = vpop.eup %1508 }
 0xcbd   :  { %814 = vrot.lane.b32.xlu0 %v1509_v32, %s1556_s6 }
 0xd2f   :  { %v815_v35 = vpop.permute.xlu0 %814 }
 0xd30   :  { %v817_v38 = vmul.f32 %v815_v35, %v812_v34 }
 0xd32   :  { %v819_v39 = vadd.f32 %v818_v37, %v817_v38 }
 0xd34   :  { %v826_v40 = vsel %vm825_vm11, %v819_v39, %v700_v12 }
 0xd35   :  { %v873_v41 = vpack.c.bf16 %v826_v40, %v826_v40 }
 0xd37   :  { %875 = vrot.lane.b32.xlu1 %v873_v41, %s1556_s6 }
 0xda9   :  { %v876_v42 = vpop.permute.xlu1 %875 }
 0xdaa   :  { %1429 = vmatmul.mubr.msk.bf16.vlgmr.msra.gmra.mrb[24].mxu1 %vm64_vm1, %v876_v42 }
 0xdab   :  { %1441 = vmatpush3.bf16.msra.mxu1 %v1640_v11  ;;  %1444 = vmatprep.mubr.msk.bf16.mxu1 %vm1553_vm0, %v1552_v1 }
 0xdac   :  { %1442 = vmatprep.subr.bf16.mxu1 %v1552_v1 }
 0xdaf   :  { %1443 = vmatpush3.bf16.msra.mxu1 %v1659_v14 }
 0xdb0   :  { %1456 = vmatprep.subr.bf16.mxu1 %v1552_v1 }
 0xe7d   :  { %v914_v7 = vpop.f32.mrb[24].mxu1 }
 0xe7e   :  { %v915_v44 = vadd.f32 %v1760_v43, %v914_v7  ;;  %v1430_v46 = vpop.f32.mrb[25].mxu1 }
 0xe7f   :  { %v917_v47 = vpop.f32.mrb[26].mxu1 }
 0xe80   :  { %928 = vrot.lane.b32.xlu0 %v915_v44, %s1555_s3  ;;  %v1431_v48 = vpop.f32.mrb[27].mxu1  ;;  %v920_v49 = vadd.f32 %v915_v44, %v1772_v15 }
 0xe82   :  { %v1257_v50 = vmul.f32 -1.442695, %v920_v49 }
 0xe84   :  { %949 = vperm.xlu0 %1471, %v947_v60   ;;  %1510 = vpow2.f32 %v1257_v50 }
 0xe8e   :  { %v1511_v45 = vpop.eup %1510 }
 0xe8f   :  { %v924_v51 = vadd.f32 1.0, %v1511_v45 }
 0xe91   :  { %1512 = vrcp.f32 %v924_v51 }
 0xe9b   :  { %v1513_v52 = vpop.eup %1512 }
 0xe9c   :  { %v938_v59 = vsub.f32 1.0, %v1513_v52  ;;  %v944_v63 = vmul.f32 %v1513_v52, %v826_v40 }
 0xef2   :  { %v929_v53 = vpop.permute.xlu0 %928 }
 0xef3   :  { %v931_v54 = vmul.f32 %v1513_v52, %v929_v53 }
 0xef5   :  { %933 = vrot.lane.b32.xlu1 %v931_v54, %s1555_s3 }
 0xf03   :  { %v950_v62 = vpop.permute.xlu0 %949 }
 0xf04   :  { %vm951_vm13 = vcmp.eq.s32.totalorder %v950_v62, 1 }
 0xf67   :  { %v934_v56 = vpop.permute.xlu1 %933 }
 0xf68   :  { %v936_v57 = vadd.f32 %v934_v56, %v1772_v15 }
 0xf6a   :  { %1514 = vtanh.f32 %v936_v57 }
 0xf74   :  { %v1515_v58 = vpop.eup %1514 }
 0xf75   :  { %940 = vrot.lane.b32.xlu1 %v1515_v58, %s1556_s6 }
 0xfe7   :  { %v941_v61 = vpop.permute.xlu1 %940 }
 0xfe8   :  { %v943_v0 = vmul.f32 %v941_v61, %v938_v59 }
 0xfea   :  { %v945_v3 = vadd.f32 %v944_v63, %v943_v0 }
 0xfec   :  { %v952_v4 = vsel %vm951_vm13, %v945_v3, %v826_v40 }
 0xfed   :  { %v999_v5 = vpack.c.bf16 %v952_v4, %v952_v4 }
 0xfef   :  { %1001 = vrot.lane.b32.xlu0 %v999_v5, %s1556_s6 }
0x1061   :  { %v1002_v6 = vpop.permute.xlu0 %1001 }
0x1062   :  { %1445 = vmatmul.mubr.msk.bf16.vlgmr.msra.gmra.mrb[28].mxu1 %vm64_vm1, %v1002_v6 }
0x1063   :  { %1457 = vmatpush3.bf16.msra.mxu1 %v1640_v11  ;;  %1460 = vmatprep.mubr.msk.bf16.mxu1 %vm1553_vm0, %v1552_v1  ;;  %vm1198_vm0 = vcmp.gt.s32.totalorder %v1750_v33, 7 }
0x1064   :  { %1458 = vmatprep.subr.bf16.mxu1 %v1552_v1  ;;  %v1199_v38 = vsel %vm1198_vm0, 1, %v1554_v8 }
0x1067   :  { %1459 = vmatpush3.bf16.msra.mxu1 %v1659_v14 }
0x1135   :  { %v1040_v15 = vpop.f32.mrb[28].mxu1 }
0x1136   :  { %v1041_v9 = vadd.f32 %v1760_v43, %v1040_v15  ;;  %v1446_v10 = vpop.f32.mrb[29].mxu1 }
0x1137   :  { %v1043_v12 = vpop.f32.mrb[30].mxu1 }
0x1138   :  { %1054 = vrot.lane.b32.xlu1 %v1041_v9, %s1555_s3  ;;  %v1447_v13 = vpop.f32.mrb[31].mxu1  ;;  %v1046_v11 = vadd.f32 %v1041_v9, %v1774_v20 }
0x113a   :  { %v1261_v2 = vmul.f32 -1.442695, %v1046_v11 }
0x113c   :  { %1075 = vperm.xlu1 %1470, %v1073_v16   ;;  %1516 = vpow2.f32 %v1261_v2 }
0x1146   :  { %v1517_v1 = vpop.eup %1516 }
0x1147   :  { %v1050_v17 = vadd.f32 1.0, %v1517_v1 }
0x1149   :  { %1518 = vrcp.f32 %v1050_v17 }
0x1153   :  { %v1519_v14 = vpop.eup %1518 }
0x1154   :  { %v1064_v23 = vsub.f32 1.0, %v1519_v14  ;;  %v1070_v27 = vmul.f32 %v1519_v14, %v952_v4 }
0x11aa   :  { %v1055_v18 = vpop.permute.xlu1 %1054 }
0x11ab   :  { %v1057_v19 = vmul.f32 %v1519_v14, %v1055_v18 }
0x11ad   :  { %1059 = vrot.lane.b32.xlu0 %v1057_v19, %s1555_s3 }
0x11bb   :  { %v1076_v26 = vpop.permute.xlu1 %1075 }
0x11bc   :  { %vm1077_vm15 = vcmp.eq.s32.totalorder %v1076_v26, 1 }
0x121f   :  { %v1060_v55 = vpop.permute.xlu0 %1059 }
0x1220   :  { %v1062_v21 = vadd.f32 %v1060_v55, %v1774_v20 }
0x1222   :  { %1520 = vtanh.f32 %v1062_v21 }
0x122c   :  { %v1521_v22 = vpop.eup %1520 }
0x122d   :  { %1066 = vrot.lane.b32.xlu0 %v1521_v22, %s1556_s6 }
0x129f   :  { %v1067_v24 = vpop.permute.xlu0 %1066 }
0x12a0   :  { %v1069_v28 = vmul.f32 %v1067_v24, %v1064_v23 }
0x12a2   :  { %v1071_v29 = vadd.f32 %v1070_v27, %v1069_v28 }
0x12a4   :  { %v1078_v30 = vsel %vm1077_vm15, %v1071_v29, %v952_v4 }
0x12a5   :  { %v1125_v31 = vpack.c.bf16 %v1078_v30, %v1078_v30 }
0x12a7   :  { %1127 = vrot.lane.b32.xlu1 %v1125_v31, %s1556_s6 }
0x1319   :  { %v1128_v32 = vpop.permute.xlu1 %1127 }
0x131a   :  { %1461 = vmatmul.mubr.msk.bf16.vlgmr.msra.gmra.mrb[32].mxu1 %vm64_vm1, %v1128_v32 }
0x13ed   :  { %v1166_v34 = vpop.f32.mrb[32].mxu1 }
0x13ee   :  { %v1167_v20 = vadd.f32 %v1760_v43, %v1166_v34  ;;  %v1462_v35 = vpop.f32.mrb[33].mxu1 }
0x13ef   :  { %v1169_v36 = vpop.f32.mrb[34].mxu1 }
0x13f0   :  { %1180 = vrot.lane.b32.xlu0 %v1167_v20, %s1555_s3  ;;  %v1463_v37 = vpop.f32.mrb[35].mxu1  ;;  %v1172_v39 = vadd.f32 %v1167_v20, %v1776_v25 }
0x13f2   :  { %v1265_v40 = vmul.f32 -1.442695, %v1172_v39 }
0x13f4   :  { %1201 = vperm.xlu0 %1471, %v1199_v38   ;;  %1522 = vpow2.f32 %v1265_v40 }
0x13fe   :  { %v1523_v41 = vpop.eup %1522 }
0x13ff   :  { %v1176_v42 = vadd.f32 1.0, %v1523_v41 }
0x1401   :  { %1524 = vrcp.f32 %v1176_v42 }
0x140b   :  { %v1525_v7 = vpop.eup %1524 }
0x140c   :  { %v1190_v8 = vsub.f32 1.0, %v1525_v7  ;;  %v1196_v49 = vmul.f32 %v1525_v7, %v1078_v30 }
0x1462   :  { %v1181_v44 = vpop.permute.xlu0 %1180 }
0x1463   :  { %v1183_v43 = vmul.f32 %v1525_v7, %v1181_v44 }
0x1465   :  { %1185 = vrot.lane.b32.xlu1 %v1183_v43, %s1555_s3 }
0x1473   :  { %v1202_v60 = vpop.permute.xlu0 %1201 }
0x1474   :  { %vm1203_vm2 = vcmp.eq.s32.totalorder %v1202_v60, 1 }
0x14d7   :  { %v1186_v33 = vpop.permute.xlu1 %1185 }
0x14d8   :  { %v1188_v46 = vadd.f32 %v1186_v33, %v1776_v25 }
0x14da   :  { %1526 = vtanh.f32 %v1188_v46 }
0x14e4   :  { %v1527_v47 = vpop.eup %1526 }
0x14e5   :  { %1192 = vrot.lane.b32.xlu1 %v1527_v47, %s1556_s6 }
0x1557   :  { %v1193_v48 = vpop.permute.xlu1 %1192 }
0x1558   :  { %v1195_v50 = vmul.f32 %v1193_v48, %v1190_v8 }
0x155a   :  { %v1197_v45 = vadd.f32 %v1196_v49, %v1195_v50 }
0x155c   :  { %v1204_v51 = vsel %vm1203_vm2, %v1197_v45, %v1078_v30 }
0x155d   :  { %1206 = vrot.lane.b32.xlu0 %v1204_v51, %s1556_s6 }
0x15cf   :  { %v1207_v52 = vpop.permute.xlu0 %1206 }
0x15d0   :  { %1209 = vst.msk [vmem:[#allocation2] sm:$0xff] %vm64_vm1, %v1207_v52 }
0x15d1   :  { %1539 = shalt.err (!%p1536_p4)
}
0x15d2   :  { %s1540_s22 = scalar_lea.hbm %s1907_s8, 128 }
0x15d3   :  { %p1541_p5 = scmp.ne.s32.totalorder %s1907_s8, %s1540_s22  ;;  %p1544_p6 = scmp.lt.u32.totalorder %s1540_s22, %s1907_s8 }
0x15d5   :  { %p1546_p7 = pnand %p1544_p6, %p1541_p5 }
0x15d7   :  { %1549 = shalt.err (!%p1546_p7)
}
0x15d8   :  { %1219 = dma.vmem_to_hbm [thread:$0]  %s1217_s19, 128, %s1907_s8, [#allocation3]  }
0x15d9   :  { %1550 = dma.done.wait [#allocation3], 128  }
0x15da   :  { %1551 = vsyncadd [#allocation3], 4294967168 }
0x15db   :  { %1223 = vsyncpa [#allocation3], 1 }

</bundles_post_ra>
